<compile_context>
chip_gen: v5e
topology: v5e:2x2
jax: 0.10.0
libtpu: 0.0.40
codegen_flags: <defaults>
</compile_context>

<pallas_src>
import functools

import jax
import jax.numpy as jnp
from jax.experimental import pallas as pl
from jax.experimental.pallas import tpu as pltpu
import numpy as np


# ---------------------------------------------------------------------------
# Pallas kernel: GRU recurrence + fused MLP heads (+ masked softmax).
# Everything is fully VMEM-resident (no grid).
# ---------------------------------------------------------------------------
def actor_kernel(
    gi_ref,      # (T*Bp, 3H) f32  hoisted input projection x@Wih + folded biases
    h0_ref,      # (Bp, H)    f32
    whh_ref,     # (H, 3H)    bf16  gate order r,z,n
    bhn_ref,     # (1, H)     f32   bhh for the n gate (scaled by r)
    w1_ref, b1_ref,   # (H, 2H) bf16, (1, 2H) f32      [policy | value] layer 1
    w2_ref, b2_ref,   # (2H, 2*H2) bf16, (1, 2*H2) f32 block-diagonal layer 2
    wo_ref, bo_ref,   # (2*H2, 128) bf16, (1, 128) f32 padded output layer
    out_ref,     # out: (T*Bp, 128) f32  [softmax policy | value | 0 pad]
    hout_ref,    # out: (Bp, H) f32      final GRU hidden state
    seq_ref,     # scratch: (T*Bp, H) f32 GRU hidden-state slab
    *,
    a_dim,       # static: number of policy logits
):
    H = whh_ref.shape[0]
    Bp = h0_ref.shape[0]
    T = seq_ref.shape[0] // Bp

    whh = whh_ref[...]            # bf16, resident once
    bhn = bhn_ref[...]            # f32

    # -------- GRU recurrence (PyTorch gate equations), fully unrolled --------
    h = h0_ref[...]                                      # f32 (Bp, H)
    for t in range(T):                                   # static unroll (T small)
        gi = gi_ref[t * Bp:(t + 1) * Bp, :]              # f32 (Bp, 3H), aligned
        gh = jnp.dot(h.astype(jnp.bfloat16), whh,
                     preferred_element_type=jnp.float32)  # (Bp, 3H) f32 acc
        rz = jax.nn.sigmoid(gi[:, :2 * H] + gh[:, :2 * H])   # r,z together (f32)
        r = rz[:, :H]
        z = rz[:, H:]
        n = jnp.tanh(gi[:, 2 * H:] + r * (gh[:, 2 * H:] + bhn))
        h = (1.0 - z) * n + z * h
        seq_ref[t * Bp:(t + 1) * Bp, :] = h              # static, 8-row aligned
    hout_ref[...] = h

    # -------- fused MLP heads on the full (T*Bp, H) slab ----------------------
    s = seq_ref[...].astype(jnp.bfloat16)                                # (T*Bp, H)
    h1 = jnp.maximum(
        jnp.dot(s, w1_ref[...], preferred_element_type=jnp.float32) + b1_ref[...],
        0.0)
    h2 = jnp.maximum(
        jnp.dot(h1.astype(jnp.bfloat16), w2_ref[...],
                preferred_element_type=jnp.float32) + b2_ref[...],
        0.0)
    out = jnp.dot(h2.astype(jnp.bfloat16), wo_ref[...],
                  preferred_element_type=jnp.float32) + bo_ref[...]      # (T*Bp, 128)

    # -------- masked softmax over the first a_dim lanes; value stays in lane A
    lane = jax.lax.broadcasted_iota(jnp.int32, out.shape, 1)
    pol_mask = lane < a_dim
    logits = jnp.where(pol_mask, out, -1e30)             # pad/value lanes -> ~-inf
    m = jnp.max(logits, axis=-1, keepdims=True)
    e = jnp.exp(logits - m)                              # 0 outside policy lanes
    denom = jnp.sum(e, axis=-1, keepdims=True)           # in [1, a_dim]
    probs = e * pl.reciprocal(denom, approx=True)
    # single full-lane (unmasked) store: [probs | value | zero pad]
    out_ref[...] = jnp.where(pol_mask, probs, out)


# ---------------------------------------------------------------------------
# Wrapper: PyTorch-style batch_first interface.
# ---------------------------------------------------------------------------
def actor_forward(state_btd, h0_lbh, params):
    """state_btd: (B, T, s_dim) f32; h0_lbh: (1, B, H) f32.
    Returns (pn_out (B,T,a_dim), sn_out (B,T,1), h (1,B,H))."""
    B, T, s_dim = state_btd.shape
    H = params["whh"].shape[0]
    A = params["wpo"].shape[1]
    H2 = params["wp2"].shape[1]
    OUT_W = 128                      # lane-dense padded output width (>= A + 1)
    assert A + 1 <= OUT_W

    # Pad batch to a full 8-sublane multiple (padded rows are zero, sliced off).
    Bp = max(8, ((B + 7) // 8) * 8)

    x_tbd = jnp.transpose(state_btd, (1, 0, 2))                  # (T, B, s_dim)
    x_tbd = jnp.pad(x_tbd, ((0, 0), (0, Bp - B), (0, 0)))
    x2d = x_tbd.reshape(T * Bp, s_dim)

    h0 = jnp.pad(h0_lbh[0], ((0, Bp - B), (0, 0)))               # (Bp, H)

    # ---- fold biases: r,z gates always see bih+bhh; n keeps bhh separate ----
    bih, bhh = params["bih"], params["bhh"]
    bx = jnp.concatenate([bih[:, :2 * H] + bhh[:, :2 * H], bih[:, 2 * H:]], axis=1)
    bhn = bhh[:, 2 * H:]                                         # (1, H)

    # ---- hoisted input projection (XLA GEMM): lane-dense kernel input -------
    gi_all = x2d @ params["wih"] + bx                            # (T*Bp, 3H) f32

    # ---- fuse the policy/value heads: [policy | value] branch order ----------
    W1 = jnp.concatenate([params["wp1"], params["ws1"]], axis=1)          # (H, 2H)
    b1 = jnp.concatenate([params["bp1"], params["bs1"]], axis=1)          # (1, 2H)
    zHH2 = jnp.zeros((H, H2), jnp.float32)
    W2 = jnp.concatenate(                                                  # (2H, 2*H2)
        [jnp.concatenate([params["wp2"], zHH2], axis=1),
         jnp.concatenate([zHH2, params["ws2"]], axis=1)], axis=0)
    b2 = jnp.concatenate([params["bp2"], params["bs2"]], axis=1)          # (1, 2*H2)
    # output layer padded to OUT_W lanes: columns [0:A]=policy, [A]=value, rest 0
    Wo = jnp.zeros((2 * H2, OUT_W), jnp.float32)
    Wo = Wo.at[:H2, :A].set(params["wpo"])
    Wo = Wo.at[H2:, A:A + 1].set(params["wso"])
    bo = jnp.zeros((1, OUT_W), jnp.float32)
    bo = bo.at[:, :A].set(params["bpo"])
    bo = bo.at[:, A:A + 1].set(params["bso"])

    # bf16 MXU operands; biases / element-wise stay f32.
    whh_bf = params["whh"].astype(jnp.bfloat16)
    W1_bf = W1.astype(jnp.bfloat16)
    W2_bf = W2.astype(jnp.bfloat16)
    Wo_bf = Wo.astype(jnp.bfloat16)

    vmem = pl.BlockSpec(memory_space=pltpu.MemorySpace.VMEM)
    args = (gi_all, h0, whh_bf, bhn, W1_bf, b1, W2_bf, b2, Wo_bf, bo)

    out2d, h_out = pl.pallas_call(
        functools.partial(actor_kernel, a_dim=A),
        out_shape=(
            jax.ShapeDtypeStruct((T * Bp, OUT_W), jnp.float32),
            jax.ShapeDtypeStruct((Bp, H), jnp.float32),
        ),
        in_specs=[vmem] * len(args),
        out_specs=(vmem, vmem),
        scratch_shapes=[pltpu.VMEM((T * Bp, H), jnp.float32)],
    )(*args)

    out_tb = out2d.reshape(T, Bp, OUT_W)[:, :B]                  # (T, B, OUT_W)
    pn_out = jnp.transpose(out_tb[..., :A], (1, 0, 2))           # (B, T, A)
    sn_out = jnp.transpose(out_tb[..., A:A + 1], (1, 0, 2))      # (B, T, 1)
    return pn_out, sn_out, h_out[:B][None, :, :]                 # (1, B, H)


# ---------------------------------------------------------------------------
# Pure-JAX reference (same math, f32) for a correctness check.
# ---------------------------------------------------------------------------
def actor_ref(state_btd, h0_lbh, params):
    H = params["whh"].shape[0]

    def cell(h, x_t):
        gi = x_t @ params["wih"] + params["bih"]
        gh = h @ params["whh"] + params["bhh"]
        r = jax.nn.sigmoid(gi[:, :H] + gh[:, :H])
        z = jax.nn.sigmoid(gi[:, H:2 * H] + gh[:, H:2 * H])
        n = jnp.tanh(gi[:, 2 * H:] + r * gh[:, 2 * H:])
        h_new = (1.0 - z) * n + z * h
        return h_new, h_new

    x_tbd = jnp.transpose(state_btd, (1, 0, 2))
    h_final, seq = jax.lax.scan(cell, h0_lbh[0], x_tbd)
    s = jnp.transpose(seq, (1, 0, 2))                             # (B, T, H)

    v = jax.nn.relu(s @ params["ws1"] + params["bs1"])
    v = jax.nn.relu(v @ params["ws2"] + params["bs2"])
    v = v @ params["wso"] + params["bso"]

    p = jax.nn.relu(s @ params["wp1"] + params["bp1"])
    p = jax.nn.relu(p @ params["wp2"] + params["bp2"])
    p = jax.nn.softmax(p @ params["wpo"] + params["bpo"], axis=-1)
    return p, v, h_final[None, :, :]


# ---------------------------------------------------------------------------
# Deterministic parameter init (PyTorch-style uniform(-1/sqrt(fan), 1/sqrt(fan))).
# ---------------------------------------------------------------------------
def init_params(key, s_dim, a_dim, H):
    H2 = H // 2
    keys = jax.random.split(key, 20)
    k = iter(keys)

    def u(kk, shape, fan):
        b = 1.0 / np.sqrt(fan)
        return jax.random.uniform(kk, shape, jnp.float32, -b, b)

    p = {}
    # GRU: torch stores weight_ih_l0 (3H, s_dim); we pass it transposed.
    p["wih"] = u(next(k), (3 * H, s_dim), H).T                    # (s_dim, 3H)
    p["whh"] = u(next(k), (3 * H, H), H).T                        # (H, 3H)
    p["bih"] = u(next(k), (1, 3 * H), H)
    p["bhh"] = u(next(k), (1, 3 * H), H)
    # value head
    p["ws1"] = u(next(k), (H, H), H).T
    p["bs1"] = u(next(k), (1, H), H)
    p["ws2"] = u(next(k), (H2, H), H).T
    p["bs2"] = u(next(k), (1, H2), H)
    p["wso"] = u(next(k), (1, H2), H2).T
    p["bso"] = u(next(k), (1, 1), H2)
    # policy head
    p["wp1"] = u(next(k), (H, H), H).T
    p["bp1"] = u(next(k), (1, H), H)
    p["wp2"] = u(next(k), (H2, H), H).T
    p["bp2"] = u(next(k), (1, H2), H)
    p["wpo"] = u(next(k), (a_dim, H2), H2).T
    p["bpo"] = u(next(k), (1, a_dim), H2)
    return p


if __name__ == "__main__":
    # Small shapes consistent with the module:
    #   b_dim (batch) = 2, seq = 8, s_dim = 8, a_dim = 4, linear_base (H) = 128
    B, T, S_DIM, A_DIM, H = 2, 8, 8, 4, 128

    key = jax.random.PRNGKey(0)
    k_param, k_state = jax.random.split(key)
    params = init_params(k_param, S_DIM, A_DIM, H)

    state = jax.random.normal(k_state, (B, T, S_DIM), dtype=jnp.float32)
    # self.initial_hidden: zeros of shape (rnn_layers, b_dim, linear_base)
    h0 = jnp.zeros((1, B, H), dtype=jnp.float32)

    pn_out, sn_out, h_out = jax.block_until_ready(
        actor_forward(state, h0, params))

    # Correctness check against a pure-JAX f32 reference (kernel uses bf16 MXU
    # operands, so tolerance is a bit looser than pure-f32 would need).
    pn_ref, sn_ref, h_ref = jax.block_until_ready(actor_ref(state, h0, params))
    assert pn_out.shape == (B, T, A_DIM)
    assert sn_out.shape == (B, T, 1)
    assert h_out.shape == (1, B, H)
    np.testing.assert_allclose(np.asarray(pn_out), np.asarray(pn_ref),
                               rtol=2e-2, atol=2e-2)
    np.testing.assert_allclose(np.asarray(sn_out), np.asarray(sn_ref),
                               rtol=2e-2, atol=2e-2)
    np.testing.assert_allclose(np.asarray(h_out), np.asarray(h_ref),
                               rtol=2e-2, atol=2e-2)

    print("KERNEL_OK")
</pallas_src>

<mosaic_0001>
module attributes {stable_mosaic.version = 11 : i64} {
  func.func @actor_kernel(%arg0: memref<64x384xf32, #tpu.memory_space<vmem>>, %arg1: memref<8x128xf32, #tpu.memory_space<vmem>>, %arg2: memref<128x384xbf16, #tpu.memory_space<vmem>>, %arg3: memref<1x128xf32, #tpu.memory_space<vmem>>, %arg4: memref<128x256xbf16, #tpu.memory_space<vmem>>, %arg5: memref<1x256xf32, #tpu.memory_space<vmem>>, %arg6: memref<256x128xbf16, #tpu.memory_space<vmem>>, %arg7: memref<1x128xf32, #tpu.memory_space<vmem>>, %arg8: memref<128x128xbf16, #tpu.memory_space<vmem>>, %arg9: memref<1x128xf32, #tpu.memory_space<vmem>>, %arg10: memref<64x128xf32, #tpu.memory_space<vmem>>, %arg11: memref<8x128xf32, #tpu.memory_space<vmem>>, %arg12: memref<64x128xf32, #tpu.memory_space<vmem>>) attributes {dimension_semantics = [], scalar_prefetch = 0 : i64, scratch_operands = 1 : i64, tpu.core_type = #tpu.core_type<tc>} {
    %c0 = arith.constant 0 : index
    %c0_0 = arith.constant 0 : index
    %0 = vector.load %arg2[%c0, %c0_0] : memref<128x384xbf16, #tpu.memory_space<vmem>>, vector<128x384xbf16>
    %c0_1 = arith.constant 0 : index
    %c0_2 = arith.constant 0 : index
    %1 = vector.load %arg3[%c0_1, %c0_2] : memref<1x128xf32, #tpu.memory_space<vmem>>, vector<1x128xf32>
    %c0_3 = arith.constant 0 : index
    %c0_4 = arith.constant 0 : index
    %2 = vector.load %arg1[%c0_3, %c0_4] : memref<8x128xf32, #tpu.memory_space<vmem>>, vector<8x128xf32>
    %c0_5 = arith.constant 0 : index
    %c0_6 = arith.constant 0 : index
    %3 = vector.load %arg0[%c0_5, %c0_6] : memref<64x384xf32, #tpu.memory_space<vmem>>, vector<8x384xf32>
    %4 = arith.truncf %2 : vector<8x128xf32> to vector<8x128xbf16>
    %cst = arith.constant dense<0.000000e+00> : vector<8x384xf32>
    %5 = tpu.matmul %4, %0, %cst {dimension_numbers = #tpu.dot_dimension_numbers<[1], [0], [0], [1], [0, 0, 1, 1], [], []>} : vector<8x128xbf16>, vector<128x384xbf16>, vector<8x384xf32> -> vector<8x384xf32>
    %6 = vector.extract_strided_slice %3 {offsets = [0, 0], sizes = [8, 256], strides = [1, 1]} : vector<8x384xf32> to vector<8x256xf32>
    %7 = vector.extract_strided_slice %5 {offsets = [0, 0], sizes = [8, 256], strides = [1, 1]} : vector<8x384xf32> to vector<8x256xf32>
    %8 = arith.addf %6, %7 : vector<8x256xf32>
    %9 = arith.negf %8 : vector<8x256xf32>
    %10 = math.exp %9 : vector<8x256xf32>
    %cst_7 = arith.constant 1.000000e+00 : f32
    %11 = vector.broadcast %cst_7 : f32 to vector<8x256xf32>
    %12 = arith.addf %11, %10 : vector<8x256xf32>
    %13 = arith.divf %11, %12 : vector<8x256xf32>
    %14 = vector.extract_strided_slice %13 {offsets = [0, 0], sizes = [8, 128], strides = [1, 1]} : vector<8x256xf32> to vector<8x128xf32>
    %15 = vector.extract_strided_slice %13 {offsets = [0, 128], sizes = [8, 128], strides = [1, 1]} : vector<8x256xf32> to vector<8x128xf32>
    %16 = vector.extract_strided_slice %3 {offsets = [0, 256], sizes = [8, 128], strides = [1, 1]} : vector<8x384xf32> to vector<8x128xf32>
    %17 = vector.extract_strided_slice %5 {offsets = [0, 256], sizes = [8, 128], strides = [1, 1]} : vector<8x384xf32> to vector<8x128xf32>
    %18 = vector.broadcast %1 : vector<1x128xf32> to vector<8x128xf32>
    %19 = arith.addf %17, %18 : vector<8x128xf32>
    %20 = arith.mulf %14, %19 : vector<8x128xf32>
    %21 = arith.addf %16, %20 : vector<8x128xf32>
    %22 = math.tanh %21 : vector<8x128xf32>
    %cst_8 = arith.constant 1.000000e+00 : f32
    %23 = vector.broadcast %cst_8 : f32 to vector<8x128xf32>
    %24 = arith.subf %23, %15 : vector<8x128xf32>
    %25 = arith.mulf %24, %22 : vector<8x128xf32>
    %26 = arith.mulf %15, %2 : vector<8x128xf32>
    %27 = arith.addf %25, %26 : vector<8x128xf32>
    %c0_9 = arith.constant 0 : index
    %c0_10 = arith.constant 0 : index
    %28 = vector.load %arg12[%c0_9, %c0_10] : memref<64x128xf32, #tpu.memory_space<vmem>>, vector<8x128xf32>
    tpu.vector_store %arg12[%c0_9, %c0_10], %27 {strides = array<i32>} : memref<64x128xf32, #tpu.memory_space<vmem>>, vector<8x128xf32>,
    %c8 = arith.constant 8 : index
    %c0_11 = arith.constant 0 : index
    %29 = vector.load %arg0[%c8, %c0_11] : memref<64x384xf32, #tpu.memory_space<vmem>>, vector<8x384xf32>
    %30 = arith.truncf %27 : vector<8x128xf32> to vector<8x128xbf16>
    %cst_12 = arith.constant dense<0.000000e+00> : vector<8x384xf32>
    %31 = tpu.matmul %30, %0, %cst_12 {dimension_numbers = #tpu.dot_dimension_numbers<[1], [0], [0], [1], [0, 0, 1, 1], [], []>} : vector<8x128xbf16>, vector<128x384xbf16>, vector<8x384xf32> -> vector<8x384xf32>
    %32 = vector.extract_strided_slice %29 {offsets = [0, 0], sizes = [8, 256], strides = [1, 1]} : vector<8x384xf32> to vector<8x256xf32>
    %33 = vector.extract_strided_slice %31 {offsets = [0, 0], sizes = [8, 256], strides = [1, 1]} : vector<8x384xf32> to vector<8x256xf32>
    %34 = arith.addf %32, %33 : vector<8x256xf32>
    %35 = arith.negf %34 : vector<8x256xf32>
    %36 = math.exp %35 : vector<8x256xf32>
    %cst_13 = arith.constant 1.000000e+00 : f32
    %37 = vector.broadcast %cst_13 : f32 to vector<8x256xf32>
    %38 = arith.addf %37, %36 : vector<8x256xf32>
    %39 = arith.divf %37, %38 : vector<8x256xf32>
    %40 = vector.extract_strided_slice %39 {offsets = [0, 0], sizes = [8, 128], strides = [1, 1]} : vector<8x256xf32> to vector<8x128xf32>
    %41 = vector.extract_strided_slice %39 {offsets = [0, 128], sizes = [8, 128], strides = [1, 1]} : vector<8x256xf32> to vector<8x128xf32>
    %42 = vector.extract_strided_slice %29 {offsets = [0, 256], sizes = [8, 128], strides = [1, 1]} : vector<8x384xf32> to vector<8x128xf32>
    %43 = vector.extract_strided_slice %31 {offsets = [0, 256], sizes = [8, 128], strides = [1, 1]} : vector<8x384xf32> to vector<8x128xf32>
    %44 = vector.broadcast %1 : vector<1x128xf32> to vector<8x128xf32>
    %45 = arith.addf %43, %44 : vector<8x128xf32>
    %46 = arith.mulf %40, %45 : vector<8x128xf32>
    %47 = arith.addf %42, %46 : vector<8x128xf32>
    %48 = math.tanh %47 : vector<8x128xf32>
    %cst_14 = arith.constant 1.000000e+00 : f32
    %49 = vector.broadcast %cst_14 : f32 to vector<8x128xf32>
    %50 = arith.subf %49, %41 : vector<8x128xf32>
    %51 = arith.mulf %50, %48 : vector<8x128xf32>
    %52 = arith.mulf %41, %27 : vector<8x128xf32>
    %53 = arith.addf %51, %52 : vector<8x128xf32>
    %c8_15 = arith.constant 8 : index
    %c0_16 = arith.constant 0 : index
    %54 = vector.load %arg12[%c8_15, %c0_16] : memref<64x128xf32, #tpu.memory_space<vmem>>, vector<8x128xf32>
    tpu.vector_store %arg12[%c8_15, %c0_16], %53 {strides = array<i32>} : memref<64x128xf32, #tpu.memory_space<vmem>>, vector<8x128xf32>,
    %c16 = arith.constant 16 : index
    %c0_17 = arith.constant 0 : index
    %55 = vector.load %arg0[%c16, %c0_17] : memref<64x384xf32, #tpu.memory_space<vmem>>, vector<8x384xf32>
    %56 = arith.truncf %53 : vector<8x128xf32> to vector<8x128xbf16>
    %cst_18 = arith.constant dense<0.000000e+00> : vector<8x384xf32>
    %57 = tpu.matmul %56, %0, %cst_18 {dimension_numbers = #tpu.dot_dimension_numbers<[1], [0], [0], [1], [0, 0, 1, 1], [], []>} : vector<8x128xbf16>, vector<128x384xbf16>, vector<8x384xf32> -> vector<8x384xf32>
    %58 = vector.extract_strided_slice %55 {offsets = [0, 0], sizes = [8, 256], strides = [1, 1]} : vector<8x384xf32> to vector<8x256xf32>
    %59 = vector.extract_strided_slice %57 {offsets = [0, 0], sizes = [8, 256], strides = [1, 1]} : vector<8x384xf32> to vector<8x256xf32>
    %60 = arith.addf %58, %59 : vector<8x256xf32>
    %61 = arith.negf %60 : vector<8x256xf32>
    %62 = math.exp %61 : vector<8x256xf32>
    %cst_19 = arith.constant 1.000000e+00 : f32
    %63 = vector.broadcast %cst_19 : f32 to vector<8x256xf32>
    %64 = arith.addf %63, %62 : vector<8x256xf32>
    %65 = arith.divf %63, %64 : vector<8x256xf32>
    %66 = vector.extract_strided_slice %65 {offsets = [0, 0], sizes = [8, 128], strides = [1, 1]} : vector<8x256xf32> to vector<8x128xf32>
    %67 = vector.extract_strided_slice %65 {offsets = [0, 128], sizes = [8, 128], strides = [1, 1]} : vector<8x256xf32> to vector<8x128xf32>
    %68 = vector.extract_strided_slice %55 {offsets = [0, 256], sizes = [8, 128], strides = [1, 1]} : vector<8x384xf32> to vector<8x128xf32>
    %69 = vector.extract_strided_slice %57 {offsets = [0, 256], sizes = [8, 128], strides = [1, 1]} : vector<8x384xf32> to vector<8x128xf32>
    %70 = vector.broadcast %1 : vector<1x128xf32> to vector<8x128xf32>
    %71 = arith.addf %69, %70 : vector<8x128xf32>
    %72 = arith.mulf %66, %71 : vector<8x128xf32>
    %73 = arith.addf %68, %72 : vector<8x128xf32>
    %74 = math.tanh %73 : vector<8x128xf32>
    %cst_20 = arith.constant 1.000000e+00 : f32
    %75 = vector.broadcast %cst_20 : f32 to vector<8x128xf32>
    %76 = arith.subf %75, %67 : vector<8x128xf32>
    %77 = arith.mulf %76, %74 : vector<8x128xf32>
    %78 = arith.mulf %67, %53 : vector<8x128xf32>
    %79 = arith.addf %77, %78 : vector<8x128xf32>
    %c16_21 = arith.constant 16 : index
    %c0_22 = arith.constant 0 : index
    %80 = vector.load %arg12[%c16_21, %c0_22] : memref<64x128xf32, #tpu.memory_space<vmem>>, vector<8x128xf32>
    tpu.vector_store %arg12[%c16_21, %c0_22], %79 {strides = array<i32>} : memref<64x128xf32, #tpu.memory_space<vmem>>, vector<8x128xf32>,
    %c24 = arith.constant 24 : index
    %c0_23 = arith.constant 0 : index
    %81 = vector.load %arg0[%c24, %c0_23] : memref<64x384xf32, #tpu.memory_space<vmem>>, vector<8x384xf32>
    %82 = arith.truncf %79 : vector<8x128xf32> to vector<8x128xbf16>
    %cst_24 = arith.constant dense<0.000000e+00> : vector<8x384xf32>
    %83 = tpu.matmul %82, %0, %cst_24 {dimension_numbers = #tpu.dot_dimension_numbers<[1], [0], [0], [1], [0, 0, 1, 1], [], []>} : vector<8x128xbf16>, vector<128x384xbf16>, vector<8x384xf32> -> vector<8x384xf32>
    %84 = vector.extract_strided_slice %81 {offsets = [0, 0], sizes = [8, 256], strides = [1, 1]} : vector<8x384xf32> to vector<8x256xf32>
    %85 = vector.extract_strided_slice %83 {offsets = [0, 0], sizes = [8, 256], strides = [1, 1]} : vector<8x384xf32> to vector<8x256xf32>
    %86 = arith.addf %84, %85 : vector<8x256xf32>
    %87 = arith.negf %86 : vector<8x256xf32>
    %88 = math.exp %87 : vector<8x256xf32>
    %cst_25 = arith.constant 1.000000e+00 : f32
    %89 = vector.broadcast %cst_25 : f32 to vector<8x256xf32>
    %90 = arith.addf %89, %88 : vector<8x256xf32>
    %91 = arith.divf %89, %90 : vector<8x256xf32>
    %92 = vector.extract_strided_slice %91 {offsets = [0, 0], sizes = [8, 128], strides = [1, 1]} : vector<8x256xf32> to vector<8x128xf32>
    %93 = vector.extract_strided_slice %91 {offsets = [0, 128], sizes = [8, 128], strides = [1, 1]} : vector<8x256xf32> to vector<8x128xf32>
    %94 = vector.extract_strided_slice %81 {offsets = [0, 256], sizes = [8, 128], strides = [1, 1]} : vector<8x384xf32> to vector<8x128xf32>
    %95 = vector.extract_strided_slice %83 {offsets = [0, 256], sizes = [8, 128], strides = [1, 1]} : vector<8x384xf32> to vector<8x128xf32>
    %96 = vector.broadcast %1 : vector<1x128xf32> to vector<8x128xf32>
    %97 = arith.addf %95, %96 : vector<8x128xf32>
    %98 = arith.mulf %92, %97 : vector<8x128xf32>
    %99 = arith.addf %94, %98 : vector<8x128xf32>
    %100 = math.tanh %99 : vector<8x128xf32>
    %cst_26 = arith.constant 1.000000e+00 : f32
    %101 = vector.broadcast %cst_26 : f32 to vector<8x128xf32>
    %102 = arith.subf %101, %93 : vector<8x128xf32>
    %103 = arith.mulf %102, %100 : vector<8x128xf32>
    %104 = arith.mulf %93, %79 : vector<8x128xf32>
    %105 = arith.addf %103, %104 : vector<8x128xf32>
    %c24_27 = arith.constant 24 : index
    %c0_28 = arith.constant 0 : index
    %106 = vector.load %arg12[%c24_27, %c0_28] : memref<64x128xf32, #tpu.memory_space<vmem>>, vector<8x128xf32>
    tpu.vector_store %arg12[%c24_27, %c0_28], %105 {strides = array<i32>} : memref<64x128xf32, #tpu.memory_space<vmem>>, vector<8x128xf32>,
    %c32 = arith.constant 32 : index
    %c0_29 = arith.constant 0 : index
    %107 = vector.load %arg0[%c32, %c0_29] : memref<64x384xf32, #tpu.memory_space<vmem>>, vector<8x384xf32>
    %108 = arith.truncf %105 : vector<8x128xf32> to vector<8x128xbf16>
    %cst_30 = arith.constant dense<0.000000e+00> : vector<8x384xf32>
    %109 = tpu.matmul %108, %0, %cst_30 {dimension_numbers = #tpu.dot_dimension_numbers<[1], [0], [0], [1], [0, 0, 1, 1], [], []>} : vector<8x128xbf16>, vector<128x384xbf16>, vector<8x384xf32> -> vector<8x384xf32>
    %110 = vector.extract_strided_slice %107 {offsets = [0, 0], sizes = [8, 256], strides = [1, 1]} : vector<8x384xf32> to vector<8x256xf32>
    %111 = vector.extract_strided_slice %109 {offsets = [0, 0], sizes = [8, 256], strides = [1, 1]} : vector<8x384xf32> to vector<8x256xf32>
    %112 = arith.addf %110, %111 : vector<8x256xf32>
    %113 = arith.negf %112 : vector<8x256xf32>
    %114 = math.exp %113 : vector<8x256xf32>
    %cst_31 = arith.constant 1.000000e+00 : f32
    %115 = vector.broadcast %cst_31 : f32 to vector<8x256xf32>
    %116 = arith.addf %115, %114 : vector<8x256xf32>
    %117 = arith.divf %115, %116 : vector<8x256xf32>
    %118 = vector.extract_strided_slice %117 {offsets = [0, 0], sizes = [8, 128], strides = [1, 1]} : vector<8x256xf32> to vector<8x128xf32>
    %119 = vector.extract_strided_slice %117 {offsets = [0, 128], sizes = [8, 128], strides = [1, 1]} : vector<8x256xf32> to vector<8x128xf32>
    %120 = vector.extract_strided_slice %107 {offsets = [0, 256], sizes = [8, 128], strides = [1, 1]} : vector<8x384xf32> to vector<8x128xf32>
    %121 = vector.extract_strided_slice %109 {offsets = [0, 256], sizes = [8, 128], strides = [1, 1]} : vector<8x384xf32> to vector<8x128xf32>
    %122 = vector.broadcast %1 : vector<1x128xf32> to vector<8x128xf32>
    %123 = arith.addf %121, %122 : vector<8x128xf32>
    %124 = arith.mulf %118, %123 : vector<8x128xf32>
    %125 = arith.addf %120, %124 : vector<8x128xf32>
    %126 = math.tanh %125 : vector<8x128xf32>
    %cst_32 = arith.constant 1.000000e+00 : f32
    %127 = vector.broadcast %cst_32 : f32 to vector<8x128xf32>
    %128 = arith.subf %127, %119 : vector<8x128xf32>
    %129 = arith.mulf %128, %126 : vector<8x128xf32>
    %130 = arith.mulf %119, %105 : vector<8x128xf32>
    %131 = arith.addf %129, %130 : vector<8x128xf32>
    %c32_33 = arith.constant 32 : index
    %c0_34 = arith.constant 0 : index
    %132 = vector.load %arg12[%c32_33, %c0_34] : memref<64x128xf32, #tpu.memory_space<vmem>>, vector<8x128xf32>
    tpu.vector_store %arg12[%c32_33, %c0_34], %131 {strides = array<i32>} : memref<64x128xf32, #tpu.memory_space<vmem>>, vector<8x128xf32>,
    %c40 = arith.constant 40 : index
    %c0_35 = arith.constant 0 : index
    %133 = vector.load %arg0[%c40, %c0_35] : memref<64x384xf32, #tpu.memory_space<vmem>>, vector<8x384xf32>
    %134 = arith.truncf %131 : vector<8x128xf32> to vector<8x128xbf16>
    %cst_36 = arith.constant dense<0.000000e+00> : vector<8x384xf32>
    %135 = tpu.matmul %134, %0, %cst_36 {dimension_numbers = #tpu.dot_dimension_numbers<[1], [0], [0], [1], [0, 0, 1, 1], [], []>} : vector<8x128xbf16>, vector<128x384xbf16>, vector<8x384xf32> -> vector<8x384xf32>
    %136 = vector.extract_strided_slice %133 {offsets = [0, 0], sizes = [8, 256], strides = [1, 1]} : vector<8x384xf32> to vector<8x256xf32>
    %137 = vector.extract_strided_slice %135 {offsets = [0, 0], sizes = [8, 256], strides = [1, 1]} : vector<8x384xf32> to vector<8x256xf32>
    %138 = arith.addf %136, %137 : vector<8x256xf32>
    %139 = arith.negf %138 : vector<8x256xf32>
    %140 = math.exp %139 : vector<8x256xf32>
    %cst_37 = arith.constant 1.000000e+00 : f32
    %141 = vector.broadcast %cst_37 : f32 to vector<8x256xf32>
    %142 = arith.addf %141, %140 : vector<8x256xf32>
    %143 = arith.divf %141, %142 : vector<8x256xf32>
    %144 = vector.extract_strided_slice %143 {offsets = [0, 0], sizes = [8, 128], strides = [1, 1]} : vector<8x256xf32> to vector<8x128xf32>
    %145 = vector.extract_strided_slice %143 {offsets = [0, 128], sizes = [8, 128], strides = [1, 1]} : vector<8x256xf32> to vector<8x128xf32>
    %146 = vector.extract_strided_slice %133 {offsets = [0, 256], sizes = [8, 128], strides = [1, 1]} : vector<8x384xf32> to vector<8x128xf32>
    %147 = vector.extract_strided_slice %135 {offsets = [0, 256], sizes = [8, 128], strides = [1, 1]} : vector<8x384xf32> to vector<8x128xf32>
    %148 = vector.broadcast %1 : vector<1x128xf32> to vector<8x128xf32>
    %149 = arith.addf %147, %148 : vector<8x128xf32>
    %150 = arith.mulf %144, %149 : vector<8x128xf32>
    %151 = arith.addf %146, %150 : vector<8x128xf32>
    %152 = math.tanh %151 : vector<8x128xf32>
    %cst_38 = arith.constant 1.000000e+00 : f32
    %153 = vector.broadcast %cst_38 : f32 to vector<8x128xf32>
    %154 = arith.subf %153, %145 : vector<8x128xf32>
    %155 = arith.mulf %154, %152 : vector<8x128xf32>
    %156 = arith.mulf %145, %131 : vector<8x128xf32>
    %157 = arith.addf %155, %156 : vector<8x128xf32>
    %c40_39 = arith.constant 40 : index
    %c0_40 = arith.constant 0 : index
    %158 = vector.load %arg12[%c40_39, %c0_40] : memref<64x128xf32, #tpu.memory_space<vmem>>, vector<8x128xf32>
    tpu.vector_store %arg12[%c40_39, %c0_40], %157 {strides = array<i32>} : memref<64x128xf32, #tpu.memory_space<vmem>>, vector<8x128xf32>,
    %c48 = arith.constant 48 : index
    %c0_41 = arith.constant 0 : index
    %159 = vector.load %arg0[%c48, %c0_41] : memref<64x384xf32, #tpu.memory_space<vmem>>, vector<8x384xf32>
    %160 = arith.truncf %157 : vector<8x128xf32> to vector<8x128xbf16>
    %cst_42 = arith.constant dense<0.000000e+00> : vector<8x384xf32>
    %161 = tpu.matmul %160, %0, %cst_42 {dimension_numbers = #tpu.dot_dimension_numbers<[1], [0], [0], [1], [0, 0, 1, 1], [], []>} : vector<8x128xbf16>, vector<128x384xbf16>, vector<8x384xf32> -> vector<8x384xf32>
    %162 = vector.extract_strided_slice %159 {offsets = [0, 0], sizes = [8, 256], strides = [1, 1]} : vector<8x384xf32> to vector<8x256xf32>
    %163 = vector.extract_strided_slice %161 {offsets = [0, 0], sizes = [8, 256], strides = [1, 1]} : vector<8x384xf32> to vector<8x256xf32>
    %164 = arith.addf %162, %163 : vector<8x256xf32>
    %165 = arith.negf %164 : vector<8x256xf32>
    %166 = math.exp %165 : vector<8x256xf32>
    %cst_43 = arith.constant 1.000000e+00 : f32
    %167 = vector.broadcast %cst_43 : f32 to vector<8x256xf32>
    %168 = arith.addf %167, %166 : vector<8x256xf32>
    %169 = arith.divf %167, %168 : vector<8x256xf32>
    %170 = vector.extract_strided_slice %169 {offsets = [0, 0], sizes = [8, 128], strides = [1, 1]} : vector<8x256xf32> to vector<8x128xf32>
    %171 = vector.extract_strided_slice %169 {offsets = [0, 128], sizes = [8, 128], strides = [1, 1]} : vector<8x256xf32> to vector<8x128xf32>
    %172 = vector.extract_strided_slice %159 {offsets = [0, 256], sizes = [8, 128], strides = [1, 1]} : vector<8x384xf32> to vector<8x128xf32>
    %173 = vector.extract_strided_slice %161 {offsets = [0, 256], sizes = [8, 128], strides = [1, 1]} : vector<8x384xf32> to vector<8x128xf32>
    %174 = vector.broadcast %1 : vector<1x128xf32> to vector<8x128xf32>
    %175 = arith.addf %173, %174 : vector<8x128xf32>
    %176 = arith.mulf %170, %175 : vector<8x128xf32>
    %177 = arith.addf %172, %176 : vector<8x128xf32>
    %178 = math.tanh %177 : vector<8x128xf32>
    %cst_44 = arith.constant 1.000000e+00 : f32
    %179 = vector.broadcast %cst_44 : f32 to vector<8x128xf32>
    %180 = arith.subf %179, %171 : vector<8x128xf32>
    %181 = arith.mulf %180, %178 : vector<8x128xf32>
    %182 = arith.mulf %171, %157 : vector<8x128xf32>
    %183 = arith.addf %181, %182 : vector<8x128xf32>
    %c48_45 = arith.constant 48 : index
    %c0_46 = arith.constant 0 : index
    %184 = vector.load %arg12[%c48_45, %c0_46] : memref<64x128xf32, #tpu.memory_space<vmem>>, vector<8x128xf32>
    tpu.vector_store %arg12[%c48_45, %c0_46], %183 {strides = array<i32>} : memref<64x128xf32, #tpu.memory_space<vmem>>, vector<8x128xf32>,
    %c56 = arith.constant 56 : index
    %c0_47 = arith.constant 0 : index
    %185 = vector.load %arg0[%c56, %c0_47] : memref<64x384xf32, #tpu.memory_space<vmem>>, vector<8x384xf32>
    %186 = arith.truncf %183 : vector<8x128xf32> to vector<8x128xbf16>
    %cst_48 = arith.constant dense<0.000000e+00> : vector<8x384xf32>
    %187 = tpu.matmul %186, %0, %cst_48 {dimension_numbers = #tpu.dot_dimension_numbers<[1], [0], [0], [1], [0, 0, 1, 1], [], []>} : vector<8x128xbf16>, vector<128x384xbf16>, vector<8x384xf32> -> vector<8x384xf32>
    %188 = vector.extract_strided_slice %185 {offsets = [0, 0], sizes = [8, 256], strides = [1, 1]} : vector<8x384xf32> to vector<8x256xf32>
    %189 = vector.extract_strided_slice %187 {offsets = [0, 0], sizes = [8, 256], strides = [1, 1]} : vector<8x384xf32> to vector<8x256xf32>
    %190 = arith.addf %188, %189 : vector<8x256xf32>
    %191 = arith.negf %190 : vector<8x256xf32>
    %192 = math.exp %191 : vector<8x256xf32>
    %cst_49 = arith.constant 1.000000e+00 : f32
    %193 = vector.broadcast %cst_49 : f32 to vector<8x256xf32>
    %194 = arith.addf %193, %192 : vector<8x256xf32>
    %195 = arith.divf %193, %194 : vector<8x256xf32>
    %196 = vector.extract_strided_slice %195 {offsets = [0, 0], sizes = [8, 128], strides = [1, 1]} : vector<8x256xf32> to vector<8x128xf32>
    %197 = vector.extract_strided_slice %195 {offsets = [0, 128], sizes = [8, 128], strides = [1, 1]} : vector<8x256xf32> to vector<8x128xf32>
    %198 = vector.extract_strided_slice %185 {offsets = [0, 256], sizes = [8, 128], strides = [1, 1]} : vector<8x384xf32> to vector<8x128xf32>
    %199 = vector.extract_strided_slice %187 {offsets = [0, 256], sizes = [8, 128], strides = [1, 1]} : vector<8x384xf32> to vector<8x128xf32>
    %200 = vector.broadcast %1 : vector<1x128xf32> to vector<8x128xf32>
    %201 = arith.addf %199, %200 : vector<8x128xf32>
    %202 = arith.mulf %196, %201 : vector<8x128xf32>
    %203 = arith.addf %198, %202 : vector<8x128xf32>
    %204 = math.tanh %203 : vector<8x128xf32>
    %cst_50 = arith.constant 1.000000e+00 : f32
    %205 = vector.broadcast %cst_50 : f32 to vector<8x128xf32>
    %206 = arith.subf %205, %197 : vector<8x128xf32>
    %207 = arith.mulf %206, %204 : vector<8x128xf32>
    %208 = arith.mulf %197, %183 : vector<8x128xf32>
    %209 = arith.addf %207, %208 : vector<8x128xf32>
    %c56_51 = arith.constant 56 : index
    %c0_52 = arith.constant 0 : index
    %210 = vector.load %arg12[%c56_51, %c0_52] : memref<64x128xf32, #tpu.memory_space<vmem>>, vector<8x128xf32>
    tpu.vector_store %arg12[%c56_51, %c0_52], %209 {strides = array<i32>} : memref<64x128xf32, #tpu.memory_space<vmem>>, vector<8x128xf32>,
    %c0_53 = arith.constant 0 : index
    %c0_54 = arith.constant 0 : index
    %211 = vector.load %arg11[%c0_53, %c0_54] : memref<8x128xf32, #tpu.memory_space<vmem>>, vector<8x128xf32>
    tpu.vector_store %arg11[%c0_53, %c0_54], %209 {strides = array<i32>} : memref<8x128xf32, #tpu.memory_space<vmem>>, vector<8x128xf32>,
    %c0_55 = arith.constant 0 : index
    %c0_56 = arith.constant 0 : index
    %212 = vector.load %arg12[%c0_55, %c0_56] : memref<64x128xf32, #tpu.memory_space<vmem>>, vector<64x128xf32>
    %213 = arith.truncf %212 : vector<64x128xf32> to vector<64x128xbf16>
    %c0_57 = arith.constant 0 : index
    %c0_58 = arith.constant 0 : index
    %214 = vector.load %arg4[%c0_57, %c0_58] : memref<128x256xbf16, #tpu.memory_space<vmem>>, vector<128x256xbf16>
    %cst_59 = arith.constant dense<0.000000e+00> : vector<64x256xf32>
    %215 = tpu.matmul %213, %214, %cst_59 {dimension_numbers = #tpu.dot_dimension_numbers<[1], [0], [0], [1], [0, 0, 1, 1], [], []>} : vector<64x128xbf16>, vector<128x256xbf16>, vector<64x256xf32> -> vector<64x256xf32>
    %c0_60 = arith.constant 0 : index
    %c0_61 = arith.constant 0 : index
    %216 = vector.load %arg5[%c0_60, %c0_61] : memref<1x256xf32, #tpu.memory_space<vmem>>, vector<1x256xf32>
    %217 = vector.broadcast %216 : vector<1x256xf32> to vector<64x256xf32>
    %218 = arith.addf %215, %217 : vector<64x256xf32>
    %cst_62 = arith.constant 0.000000e+00 : f32
    %219 = vector.broadcast %cst_62 : f32 to vector<64x256xf32>
    %220 = arith.maximumf %218, %219 : vector<64x256xf32>
    %221 = arith.truncf %220 : vector<64x256xf32> to vector<64x256xbf16>
    %c0_63 = arith.constant 0 : index
    %c0_64 = arith.constant 0 : index
    %222 = vector.load %arg6[%c0_63, %c0_64] : memref<256x128xbf16, #tpu.memory_space<vmem>>, vector<256x128xbf16>
    %cst_65 = arith.constant dense<0.000000e+00> : vector<64x128xf32>
    %223 = tpu.matmul %221, %222, %cst_65 {dimension_numbers = #tpu.dot_dimension_numbers<[1], [0], [0], [1], [0, 0, 1, 1], [], []>} : vector<64x256xbf16>, vector<256x128xbf16>, vector<64x128xf32> -> vector<64x128xf32>
    %c0_66 = arith.constant 0 : index
    %c0_67 = arith.constant 0 : index
    %224 = vector.load %arg7[%c0_66, %c0_67] : memref<1x128xf32, #tpu.memory_space<vmem>>, vector<1x128xf32>
    %225 = vector.broadcast %224 : vector<1x128xf32> to vector<64x128xf32>
    %226 = arith.addf %223, %225 : vector<64x128xf32>
    %cst_68 = arith.constant 0.000000e+00 : f32
    %227 = vector.broadcast %cst_68 : f32 to vector<64x128xf32>
    %228 = arith.maximumf %226, %227 : vector<64x128xf32>
    %229 = arith.truncf %228 : vector<64x128xf32> to vector<64x128xbf16>
    %c0_69 = arith.constant 0 : index
    %c0_70 = arith.constant 0 : index
    %230 = vector.load %arg8[%c0_69, %c0_70] : memref<128x128xbf16, #tpu.memory_space<vmem>>, vector<128x128xbf16>
    %cst_71 = arith.constant dense<0.000000e+00> : vector<64x128xf32>
    %231 = tpu.matmul %229, %230, %cst_71 {dimension_numbers = #tpu.dot_dimension_numbers<[1], [0], [0], [1], [0, 0, 1, 1], [], []>} : vector<64x128xbf16>, vector<128x128xbf16>, vector<64x128xf32> -> vector<64x128xf32>
    %c0_72 = arith.constant 0 : index
    %c0_73 = arith.constant 0 : index
    %232 = vector.load %arg9[%c0_72, %c0_73] : memref<1x128xf32, #tpu.memory_space<vmem>>, vector<1x128xf32>
    %233 = vector.broadcast %232 : vector<1x128xf32> to vector<64x128xf32>
    %234 = arith.addf %231, %233 : vector<64x128xf32>
    %235 = tpu.iota {dimensions = array<i32: 1>} : vector<64x128xi32>
    %c4_i32 = arith.constant 4 : i32
    %236 = vector.broadcast %c4_i32 : i32 to vector<64x128xi32>
    %237 = arith.cmpi slt, %235, %236 : vector<64x128xi32>
    %cst_74 = arith.constant -1.000000e+30 : f32
    %238 = vector.broadcast %cst_74 : f32 to vector<64x128xf32>
    %239 = arith.select %237, %234, %238 : vector<64x128xi1>, vector<64x128xf32>
    %cst_75 = arith.constant dense<0xFF800000> : vector<64xf32>
    %240 = vector.multi_reduction <maximumf>, %239, %cst_75 [1] : vector<64x128xf32> to vector<64xf32>
    %241 = vector.shape_cast %240 : vector<64xf32> to vector<64x1xf32>
    %242 = vector.broadcast %241 : vector<64x1xf32> to vector<64x128xf32>
    %243 = arith.subf %239, %242 : vector<64x128xf32>
    %244 = math.exp %243 : vector<64x128xf32>
    %cst_76 = arith.constant dense<0.000000e+00> : vector<64xf32>
    %245 = vector.multi_reduction <add>, %244, %cst_76 [1] : vector<64x128xf32> to vector<64xf32>
    %246 = vector.shape_cast %245 : vector<64xf32> to vector<64x1xf32>
    %247 = tpu.reciprocal %246 {approx = true} : vector<64x1xf32> -> vector<64x1xf32>
    %248 = vector.broadcast %247 : vector<64x1xf32> to vector<64x128xf32>
    %249 = arith.mulf %244, %248 : vector<64x128xf32>
    %250 = arith.select %237, %249, %234 : vector<64x128xi1>, vector<64x128xf32>
    %c0_77 = arith.constant 0 : index
    %c0_78 = arith.constant 0 : index
    %251 = vector.load %arg10[%c0_77, %c0_78] : memref<64x128xf32, #tpu.memory_space<vmem>>, vector<64x128xf32>
    tpu.vector_store %arg10[%c0_77, %c0_78], %250 {strides = array<i32>} : memref<64x128xf32, #tpu.memory_space<vmem>>, vector<64x128xf32>,
    return
  }
}

</mosaic_0001>

<bundles_post_ra>
// kernel: tpu_custom_call.1
= control target key start
LH: loop header
LB: loop body
LE: loop exit
PB: predicated region body
PF: predicated region fallthrough
CT: control target
= control target key end

     0   :  { %17 = vsyncpa [#allocation4], 0  ;;  %s2901_s0 = inlined_call_operand.hbm [shape: f32[64,384], index: 0, kind: input, shape index: {}]   ;;  %s2902_s1 = inlined_call_operand.hbm [shape: f32[8,128], index: 1, kind: input, shape index: {}]   ;;  %s2903_s2 = inlined_call_operand.hbm [shape: bf16[128,384], index: 2, kind: input, shape index: {}]   ;;  %s2904_s3 = inlined_call_operand.vmem [shape: f32[1,128], index: 3, kind: input, shape index: {}]   ;;  %s2905_s4 = inlined_call_operand.hbm [shape: bf16[128,256], index: 4, kind: input, shape index: {}]   ;;  %s2906_s5 = inlined_call_operand.vmem [shape: f32[1,256], index: 5, kind: input, shape index: {}]   ;;  %s2907_s6 = inlined_call_operand.hbm [shape: bf16[256,128], index: 6, kind: input, shape index: {}]   ;;  %s2908_s7 = inlined_call_operand.vmem [shape: f32[1,128], index: 7, kind: input, shape index: {}]   ;;  %s2909_s8 = inlined_call_operand.hbm [shape: bf16[128,128], index: 8, kind: input, shape index: {}]   ;;  %s2910_s9 = inlined_call_operand.vmem [shape: f32[1,128], index: 9, kind: input, shape index: {}]   ;;  %s2911_s10 = inlined_call_operand.hbm [shape: f32[64,128], index: 10, kind: output, shape index: {0}]   ;;  %s2912_s11 = inlined_call_operand.hbm [shape: f32[8,128], index: 11, kind: output, shape index: {1}]  }
   0x1   :  { %18 = vsyncpa [#allocation7], 0 }
   0x2   :  { %19 = vsyncpa [#allocation10], 0 }
   0x3   :  { %20 = vsyncpa [#allocation13], 0 }
   0x4   :  { %21 = vsyncpa [#allocation5], 0  ;;  %s41_s19 = sshll.u32 %s2902_s1, 4  ;;  %s42_s19 = int_to_ptr.hbm [resolvable:$true] %s41_s19 }
   0x5   :  { %22 = vsyncpa [#allocation16], 0  ;;  %s2345_s20 = smov [#allocation6]   ;;  %s66_s24 = sshll.u32 %s2905_s4, 4  ;;  %s67_s24 = int_to_ptr.hbm [resolvable:$true] %s66_s24 }
   0x6   :  { %s43_s21 = sshll.u32 %s2345_s20, 4  ;;  %s2346_s25 = smov [#allocation9]   ;;  %s44_s21 = int_to_ptr.vmem [resolvable:$true] %s43_s21 }
   0x7   :  { %46 = dma.hbm_to_vmem [thread:$0]  %s42_s19, 128, %s44_s21, [#allocation7]  }
   0x8   :  { %s68_s26 = sshll.u32 %s2346_s25, 4  ;;  %s2347_s27 = smov 128   ;;  %s69_s26 = int_to_ptr.vmem [resolvable:$true] %s68_s26 }
   0x9   :  { %s2348_s28 = smov 8   ;;  %s27_s30 = sshll.u32 %s2901_s0, 4  ;;  %s28_s30 = int_to_ptr.hbm [resolvable:$true] %s27_s30 }
   0xa   :  { %74 = dma.hbm_to_vmem [thread:$0]  %s67_s24, 2048, %s69_s26, [#allocation10], %s2347_s27, %s2347_s27, %s2348_s28  }
   0xb   :  { %s2349_s12 = smov [#allocation3]   ;;  %s51_s15 = sshll.u32 %s2903_s2, 4  ;;  %s52_s15 = int_to_ptr.hbm [resolvable:$true] %s51_s15 }
   0xc   :  { %s29_s13 = sshll.u32 %s2349_s12, 4  ;;  %s2350_s16 = smov 384   ;;  %s30_s13 = int_to_ptr.vmem [resolvable:$true] %s29_s13 }
   0xd   :  { %s2351_s17 = smov 24   ;;  %s2352_s18 = smov [#allocation8]  }
   0xe   :  { %35 = dma.hbm_to_vmem [thread:$0]  %s28_s30, 3072, %s30_s13, [#allocation4], %s2350_s16, %s2350_s16, %s2351_s17  }
   0xf   :  { %s53_s19 = sshll.u32 %s2352_s18, 4  ;;  %s2353_s20 = smov 192   ;;  %s54_s19 = int_to_ptr.vmem [resolvable:$true] %s53_s19 }
  0x10   :  { %s2354_s21 = smov 12   ;;  %s81_s23 = sshll.u32 %s2907_s6, 4  ;;  %s82_s23 = int_to_ptr.hbm [resolvable:$true] %s81_s23 }
  0x11   :  { %59 = dma.hbm_to_vmem [thread:$0]  %s52_s15, 3072, %s54_s19, [#allocation7], %s2353_s20, %s2353_s20, %s2354_s21  }
  0x12   :  { %s2355_s24 = smov [#allocation11]   ;;  %s96_s1 = sshll.u32 %s2909_s8, 4  ;;  %s97_s1 = int_to_ptr.hbm [resolvable:$true] %s96_s1 }
  0x13   :  { %s83_s25 = sshll.u32 %s2355_s24, 4  ;;  %s2356_s29 = smov 64   ;;  %s84_s25 = int_to_ptr.vmem [resolvable:$true] %s83_s25 }
  0x14   :  { %s2357_s30 = smov 4   ;;  %s2358_s12 = smov [#allocation12]  }
  0x15   :  { %89 = dma.hbm_to_vmem [thread:$0]  %s82_s23, 2048, %s84_s25, [#allocation10], %s2356_s29, %s2356_s29, %s2357_s30  }
  0x16   :  { %s98_s13 = sshll.u32 %s2358_s12, 4  ;;  %s99_s13 = int_to_ptr.vmem [resolvable:$true] %s98_s13 }
  0x17   :  { %104 = dma.hbm_to_vmem [thread:$0]  %s97_s1, 1024, %s99_s13, [#allocation13], %s2356_s29, %s2356_s29, %s2357_s30  }
  0x18   :  { %2333 = dma.done.wait [#allocation4], 3072  }
  0x19   :  { %2334 = vsyncadd [#allocation4], 4294964224 }
  0x1a   :  { %2335 = dma.done.wait [#allocation7], 3200  }
  0x1b   :  { %2336 = vsyncadd [#allocation7], 4294964096 }
  0x1c   :  { %2337 = dma.done.wait [#allocation10], 4096  }
  0x1d   :  { %2338 = vsyncadd [#allocation10], 4294963200 }
  0x1e   :  { %2339 = dma.done.wait [#allocation13], 1024  }
  0x1f   :  { %2340 = vsyncadd [#allocation13], 4294966272  ;;  %v1751_v0 = vld [vmem:[#allocation8 + $0xa8] sm:$0xf]  ;;  %v1959_v1 = vld [vmem:[#allocation8 + $0xb0] sm:$0xf0] }
  0x20   :  { %v1739_v2 = vld [vmem:[#allocation8 + $0x90] sm:$0xf]  ;;  %v2442_v3 = vor.u32 %v1959_v1, %v1751_v0  ;;  %v1956_v4 = vld [vmem:[#allocation8 + $0x98] sm:$0xf0]  ;;  %v1727_v6 = vld [vmem:[#allocation8 + $0x78] sm:$0xf] }
  0x21   :  { %v2445_v5 = vor.u32 %v1956_v4, %v1739_v2  ;;  %v1953_v7 = vld [vmem:[#allocation8 + $0x80] sm:$0xf0]  ;;  %v1759_v8 = vld [vmem:[#allocation8 + $0xb0] sm:$0xf]  ;;  %v1960_v9 = vld [vmem:[#allocation8 + $0xb8] sm:$0xf0] }
  0x22   :  { %297 = vmatpush.bf16.msra.mxu1 %v2442_v3  ;;  %392 = vmatpush.bf16.msra.mxu3 %v2442_v3  ;;  %v2448_v10 = vor.u32 %v1960_v9, %v1759_v8  ;;  %v1747_v11 = vld [vmem:[#allocation8 + $0x98] sm:$0xf]  ;;  %v1957_v12 = vld [vmem:[#allocation8 + $0xa0] sm:$0xf0]  ;;  %v1958_v13 = vld [vmem:[#allocation8 + $0xac] sm:$0xf]  ;;  %v2451_v14 = vor.u32 %v1953_v7, %v1727_v6 }
  0x23   :  { %v1715_v15 = vld [vmem:[#allocation8 + $0x60] sm:$0xf]  ;;  %v2454_v16 = vor.u32 %v1957_v12, %v1747_v11  ;;  %v1753_v17 = vld [vmem:[#allocation8 + $0xb4] sm:$0xf0]  ;;  %v1950_v18 = vld [vmem:[#allocation8 + $0x68] sm:$0xf0] }
  0x24   :  { %323 = vmatpush.bf16.msra.mxu2 %v2448_v10  ;;  %v2456_v19 = vor.u32 %v1958_v13, %v1753_v17  ;;  %v1735_v20 = vld [vmem:[#allocation8 + $0x80] sm:$0xf]  ;;  %v1954_v21 = vld [vmem:[#allocation8 + $0x88] sm:$0xf0]  ;;  %v1955_v22 = vld [vmem:[#allocation8 + $0x94] sm:$0xf]  ;;  %v2461_v24 = vor.u32 %v1950_v18, %v1715_v15 }
  0x25   :  { %v1741_v23 = vld [vmem:[#allocation8 + $0x9c] sm:$0xf0]  ;;  %v1703_v25 = vld [vmem:[#allocation8 + $0x48] sm:$0xf]  ;;  %v1947_v26 = vld [vmem:[#allocation8 + $0x50] sm:$0xf0]  ;;  %v2464_v27 = vor.u32 %v1954_v21, %v1735_v20 }
  0x26   :  { %298 = vmatpush.bf16.msra.mxu1 %v2445_v5  ;;  %393 = vmatpush.bf16.msra.mxu3 %v2445_v5  ;;  %v1723_v28 = vld [vmem:[#allocation8 + $0x68] sm:$0xf]  ;;  %v2466_v29 = vor.u32 %v1955_v22, %v1741_v23  ;;  %v1951_v30 = vld [vmem:[#allocation8 + $0x70] sm:$0xf0]  ;;  %v1952_v31 = vld [vmem:[#allocation8 + $0x7c] sm:$0xf]  ;;  %v2471_v33 = vor.u32 %v1947_v26, %v1703_v25 }
  0x27   :  { %405 = vmatpush.bf16.msra.mxu0 %v2456_v19  ;;  %v1729_v32 = vld [vmem:[#allocation8 + $0x84] sm:$0xf0]  ;;  %v1691_v34 = vld [vmem:[#allocation8 + $0x30] sm:$0xf]  ;;  %v2474_v35 = vor.u32 %v1951_v30, %v1723_v28  ;;  %v1944_v36 = vld [vmem:[#allocation8 + $0x38] sm:$0xf0] }
  0x28   :  { %324 = vmatpush.bf16.msra.mxu2 %v2454_v16  ;;  %v2476_v37 = vor.u32 %v1952_v31, %v1729_v32  ;;  %v1711_v38 = vld [vmem:[#allocation8 + $0x50] sm:$0xf]  ;;  %v1948_v39 = vld [vmem:[#allocation8 + $0x58] sm:$0xf0]  ;;  %v1949_v40 = vld [vmem:[#allocation8 + $0x64] sm:$0xf]  ;;  %v2481_v42 = vor.u32 %v1944_v36, %v1691_v34 }
  0x29   :  { %v1717_v41 = vld [vmem:[#allocation8 + $0x6c] sm:$0xf0]  ;;  %v1679_v43 = vld [vmem:[#allocation8 + $0x18] sm:$0xf]  ;;  %v2484_v44 = vor.u32 %v1948_v39, %v1711_v38  ;;  %v1941_v45 = vld [vmem:[#allocation8 + $0x20] sm:$0xf0] }
  0x2a   :  { %299 = vmatpush.bf16.msra.mxu1 %v2451_v14  ;;  %394 = vmatpush.bf16.msra.mxu3 %v2451_v14  ;;  %v2486_v46 = vor.u32 %v1949_v40, %v1717_v41  ;;  %v1699_v47 = vld [vmem:[#allocation8 + $0x38] sm:$0xf]  ;;  %v1945_v48 = vld [vmem:[#allocation8 + $0x40] sm:$0xf0]  ;;  %v1946_v49 = vld [vmem:[#allocation8 + $0x4c] sm:$0xf]  ;;  %v2491_v51 = vor.u32 %v1941_v45, %v1679_v43 }
  0x2b   :  { %406 = vmatpush.bf16.msra.mxu0 %v2466_v29  ;;  %v1705_v50 = vld [vmem:[#allocation8 + $0x54] sm:$0xf0]  ;;  %v1667_v52 = vld [vmem:[#allocation8] sm:$0xf]  ;;  %v2494_v53 = vor.u32 %v1945_v48, %v1699_v47  ;;  %v1938_v54 = vld [vmem:[#allocation8 + $0x8] sm:$0xf0] }
  0x2c   :  { %325 = vmatpush.bf16.msra.mxu2 %v2464_v27  ;;  %v2496_v55 = vor.u32 %v1946_v49, %v1705_v50  ;;  %v1687_v56 = vld [vmem:[#allocation8 + $0x20] sm:$0xf]  ;;  %v1942_v57 = vld [vmem:[#allocation8 + $0x28] sm:$0xf0]  ;;  %v1943_v58 = vld [vmem:[#allocation8 + $0x34] sm:$0xf]  ;;  %v2501_v60 = vor.u32 %v1938_v54, %v1667_v52 }
  0x2d   :  { %v1693_v59 = vld [vmem:[#allocation8 + $0x3c] sm:$0xf0]  ;;  %v2503_v61 = vld [vmem:[#allocation6] sm:$0xff]  ;;  %v2506_v62 = vor.u32 %v1942_v57, %v1687_v56  ;;  %v1675_v0 = vld [vmem:[#allocation8 + $0x8] sm:$0xf]  ;;  %s1647_s21 = sshll.u32 %s2912_s11, 4  ;;  %s1648_s21 = int_to_ptr.hbm [resolvable:$true] %s1647_s21 }
  0x2e   :  { %300 = vmatpush.bf16.msra.mxu1 %v2461_v24  ;;  %395 = vmatpush.bf16.msra.mxu3 %v2461_v24  ;;  %v2508_v63 = vor.u32 %v1943_v58, %v1693_v59  ;;  %v1939_v1 = vld [vmem:[#allocation8 + $0x10] sm:$0xf0]  ;;  %v1940_v2 = vld [vmem:[#allocation8 + $0x1c] sm:$0xf]  ;;  %v1681_v4 = vld [vmem:[#allocation8 + $0x24] sm:$0xf0]  ;;  %v168_v6 = vpack.c.bf16 %v2503_v61, %v2503_v61 }
  0x2f   :  { %407 = vmatpush.bf16.msra.mxu0 %v2476_v37  ;;  %v2516_v7 = vor.u32 %v1939_v1, %v1675_v0  ;;  %v2519_v8 = vor.u32 %v1940_v2, %v1681_v4  ;;  %v1937_v9 = vld [vmem:[#allocation8 + $0x4] sm:$0xf]  ;;  %v1669_v11 = vld [vmem:[#allocation8 + $0xc] sm:$0xf0]  ;;  %v165_v13 = vld [vmem:[#allocation3] sm:$0xff]  ;;  %s2360_s11 = smov [#allocation14]  }
  0x30   :  { %326 = vmatpush.bf16.msra.mxu2 %v2474_v35  ;;  %v2526_v12 = vor.u32 %v1937_v9, %v1669_v11  ;;  %v166_v30 = vld [vmem:[#allocation3 + $0x8] sm:$0xff]  ;;  %v2585_v45 = vld [vmem:[%s2904_s3] ss:$0 sm:$0xff]  ;;  %v167_v57 = vld [vmem:[#allocation3 + $0x10] sm:$0xff]  ;;  %s1631_s22 = sshll.u32 %s2360_s11, 4  ;;  %s1633_s24 = sshll.u32 %s2911_s10, 4  ;;  %s1632_s22 = int_to_ptr.vmem [resolvable:$true] %s1631_s22  ;;  %s1634_s24 = int_to_ptr.hbm [resolvable:$true] %s1633_s24 }
  0x32   :  { %301 = vmatpush.bf16.msra.mxu1 %v2471_v33  ;;  %396 = vmatpush.bf16.msra.mxu3 %v2471_v33 }
  0x33   :  { %408 = vmatpush.bf16.msra.mxu0 %v2486_v46 }
  0x34   :  { %327 = vmatpush.bf16.msra.mxu2 %v2484_v44 }
  0x36   :  { %302 = vmatpush.bf16.msra.mxu1 %v2481_v42  ;;  %397 = vmatpush.bf16.msra.mxu3 %v2481_v42 }
  0x37   :  { %409 = vmatpush.bf16.msra.mxu0 %v2496_v55 }
  0x38   :  { %328 = vmatpush.bf16.msra.mxu2 %v2494_v53 }
  0x3a   :  { %303 = vmatpush.bf16.msra.mxu1 %v2491_v51  ;;  %398 = vmatpush.bf16.msra.mxu3 %v2491_v51 }
  0x3b   :  { %410 = vmatpush.bf16.msra.mxu0 %v2508_v63 }
  0x3c   :  { %329 = vmatpush.bf16.msra.mxu2 %v2506_v62 }
  0x3e   :  { %304 = vmatpush.bf16.msra.mxu1 %v2501_v60  ;;  %399 = vmatpush.bf16.msra.mxu3 %v2501_v60 }
  0x3f   :  { %411 = vmatpush.bf16.msra.mxu0 %v2519_v8 }
  0x40   :  { %330 = vmatpush.bf16.msra.mxu2 %v2516_v7 }
  0x41   :  { %305 = vmatmul.bf16.vlgmr.msra.gmra.mxu1 %v168_v6 }
  0x42   :  { %310 = vmatpush.bf16.msrb.mxu1 %v2456_v19  ;;  %497 = vmatpush.bf16.msrb.mxu3 %v2456_v19 }
  0x43   :  { %331 = vmatmul.bf16.vlgmr.msra.gmra.mxu2 %v168_v6  ;;  %412 = vmatpush.bf16.msra.mxu0 %v2526_v12 }
  0x44   :  { %484 = vmatpush.bf16.msrb.mxu2 %v2442_v3 }
  0x46   :  { %311 = vmatpush.bf16.msrb.mxu1 %v2466_v29  ;;  %498 = vmatpush.bf16.msrb.mxu3 %v2466_v29 }
  0x47   :  { %510 = vmatpush.bf16.msrb.mxu0 %v2448_v10 }
  0x48   :  { %485 = vmatpush.bf16.msrb.mxu2 %v2445_v5 }
  0x4a   :  { %312 = vmatpush.bf16.msrb.mxu1 %v2476_v37  ;;  %499 = vmatpush.bf16.msrb.mxu3 %v2476_v37 }
  0x4b   :  { %511 = vmatpush.bf16.msrb.mxu0 %v2454_v16 }
  0x4c   :  { %486 = vmatpush.bf16.msrb.mxu2 %v2451_v14 }
  0x4e   :  { %313 = vmatpush.bf16.msrb.mxu1 %v2486_v46  ;;  %500 = vmatpush.bf16.msrb.mxu3 %v2486_v46 }
  0x4f   :  { %512 = vmatpush.bf16.msrb.mxu0 %v2464_v27 }
  0x50   :  { %487 = vmatpush.bf16.msrb.mxu2 %v2461_v24 }
  0x52   :  { %314 = vmatpush.bf16.msrb.mxu1 %v2496_v55  ;;  %501 = vmatpush.bf16.msrb.mxu3 %v2496_v55 }
  0x53   :  { %513 = vmatpush.bf16.msrb.mxu0 %v2474_v35 }
  0x54   :  { %488 = vmatpush.bf16.msrb.mxu2 %v2471_v33 }
  0x56   :  { %315 = vmatpush.bf16.msrb.mxu1 %v2508_v63  ;;  %502 = vmatpush.bf16.msrb.mxu3 %v2508_v63 }
  0x57   :  { %514 = vmatpush.bf16.msrb.mxu0 %v2484_v44 }
  0x58   :  { %489 = vmatpush.bf16.msrb.mxu2 %v2481_v42 }
  0x5a   :  { %316 = vmatpush.bf16.msrb.mxu1 %v2519_v8  ;;  %503 = vmatpush.bf16.msrb.mxu3 %v2519_v8 }
  0x5b   :  { %515 = vmatpush.bf16.msrb.mxu0 %v2494_v53 }
  0x5c   :  { %490 = vmatpush.bf16.msrb.mxu2 %v2491_v51 }
  0x5e   :  { %317 = vmatpush.bf16.msrb.mxu1 %v2526_v12  ;;  %504 = vmatpush.bf16.msrb.mxu3 %v2526_v12 }
  0x5f   :  { %516 = vmatpush.bf16.msrb.mxu0 %v2506_v62 }
  0x60   :  { %491 = vmatpush.bf16.msrb.mxu2 %v2501_v60 }
  0x61   :  { %318 = vmatmul.bf16.vlgmr.msrb.gmra.mxu1 %v168_v6 }
  0x62   :  { %418 = vmatpush.bf16.msra.mxu1 %v2448_v10 }
  0x63   :  { %517 = vmatpush.bf16.msrb.mxu0 %v2516_v7 }
  0x64   :  { %589 = vmatpush.bf16.msra.mxu2 %v2456_v19 }
  0x66   :  { %419 = vmatpush.bf16.msra.mxu1 %v2454_v16 }
  0x68   :  { %590 = vmatpush.bf16.msra.mxu2 %v2466_v29 }
  0x6a   :  { %420 = vmatpush.bf16.msra.mxu1 %v2464_v27 }
  0x6c   :  { %591 = vmatpush.bf16.msra.mxu2 %v2476_v37 }
  0x6e   :  { %421 = vmatpush.bf16.msra.mxu1 %v2474_v35 }
  0x70   :  { %592 = vmatpush.bf16.msra.mxu2 %v2486_v46 }
  0x72   :  { %422 = vmatpush.bf16.msra.mxu1 %v2484_v44 }
  0x74   :  { %593 = vmatpush.bf16.msra.mxu2 %v2496_v55 }
  0x76   :  { %423 = vmatpush.bf16.msra.mxu1 %v2494_v53 }
  0x78   :  { %594 = vmatpush.bf16.msra.mxu2 %v2508_v63 }
  0x7a   :  { %424 = vmatpush.bf16.msra.mxu1 %v2506_v62 }
  0x7c   :  { %595 = vmatpush.bf16.msra.mxu2 %v2519_v8 }
  0x7e   :  { %425 = vmatpush.bf16.msra.mxu1 %v2516_v7 }
  0x80   :  { %596 = vmatpush.bf16.msra.mxu2 %v2526_v12 }
  0x82   :  { %576 = vmatpush.bf16.msrb.mxu1 %v2442_v3 }
  0x86   :  { %577 = vmatpush.bf16.msrb.mxu1 %v2445_v5 }
  0x8a   :  { %578 = vmatpush.bf16.msrb.mxu1 %v2451_v14 }
  0x8e   :  { %579 = vmatpush.bf16.msrb.mxu1 %v2461_v24 }
  0x92   :  { %580 = vmatpush.bf16.msrb.mxu1 %v2471_v33 }
  0x96   :  { %581 = vmatpush.bf16.msrb.mxu1 %v2481_v42 }
  0x9a   :  { %582 = vmatpush.bf16.msrb.mxu1 %v2491_v51 }
  0x9e   :  { %583 = vmatpush.bf16.msrb.mxu1 %v2501_v60 }
  0xbe   :  { %v306_v15 = vpop.f32.mrf.mxu1 }
  0xbf   :  { %v336_v17 = vadd.f32 %v306_v15, %v165_v13 }
  0xc1   :  { %v1761_v18 = vmul.f32 -1.442695, %v336_v17 }
  0xc3   :  { %2028 = vpow2.f32 %v1761_v18 }
  0xc6   :  { %v308_v20 = vpop.f32.mrf.mxu1  ;;  %v332_v21 = vpop.f32.mrf.mxu2 }
  0xc7   :  { %v379_v52 = vadd.f32 %v2585_v45, %v332_v21 }
  0xc9   :  { %v2029_v22 = vpop.eup %2028 }
  0xca   :  { %v344_v23 = vadd.f32 1.0, %v2029_v22 }
  0xcc   :  { %2030 = vrcp.f32 %v344_v23  ;;  %vm351_vm0 = vweird.f32 %v344_v23  ;;  %v357_v39 = vand.u32 2147483648, %v344_v23  ;;  %v355_v41 = vand.u32 2147483647, %v344_v23 }
  0xce   :  { %v334_v25 = vpop.f32.mrf.mxu2  ;;  %v358_v48 = vor.u32 1.1754944e-38, %v357_v39  ;;  %vm356_vm3 = vcmp.eq.f32.partialorder %v355_v41, 8.507059e+37 }
  0xd2   :  { %v2031_v26 = vpop.eup %2030 }
  0xd3   :  { %v347_v28 = vmul.f32 %v2031_v26, %v344_v23  ;;  %vm352_vm1 = vweird.f32 %v2031_v26 }
  0xd4   :  { %vm353_vm2 = vmor %vm351_vm0, %vm352_vm1 }
  0xd5   :  { %v348_v31 = vsub.f32 1.0, %v347_v28 }
  0xd7   :  { %v349_v38 = vmul.f32 %v2031_v26, %v348_v31  ;;  %v388_v31 = vld [vmem:[#allocation3 + $0x18] sm:$0xff] }
  0xd9   :  { %v350_v40 = vadd.f32 %v2031_v26, %v349_v38 }
  0xdb   :  { %v354_v49 = vsel %vm353_vm2, %v2031_v26, %v350_v40 }
  0xdc   :  { %v359_v54 = vsel %vm356_vm3, %v358_v48, %v354_v49 }
  0xdd   :  { %v380_v56 = vmul.f32 %v379_v52, %v359_v54 }
  0xde   :  { %v319_v32 = vpop.f32.mrf.mxu1 }
  0xdf   :  { %v337_v34 = vadd.f32 %v319_v32, %v166_v30  ;;  %v381_v0 = vadd.f32 %v380_v56, %v167_v57 }
  0xe1   :  { %v1762_v36 = vmul.f32 -1.442695, %v337_v34 }
  0xe3   :  { %2032 = vpow2.f32 %v1762_v36 }
  0xe6   :  { %v321_v43 = vpop.f32.mrf.mxu1 }
  0xe9   :  { %v2033_v47 = vpop.eup %2032 }
  0xea   :  { %v345_v50 = vadd.f32 1.0, %v2033_v47 }
  0xec   :  { %2034 = vrcp.f32 %v345_v50  ;;  %v372_v2 = vand.u32 2147483648, %v345_v50  ;;  %v370_v6 = vand.u32 2147483647, %v345_v50  ;;  %vm366_vm5 = vweird.f32 %v345_v50 }
  0xed   :  { %2036 = vtanh.f32 %v381_v0 }
  0xee   :  { %v373_v11 = vor.u32 1.1754944e-38, %v372_v2  ;;  %vm371_vm7 = vcmp.eq.f32.partialorder %v370_v6, 8.507059e+37 }
  0xf2   :  { %v2035_v58 = vpop.eup %2034 }
  0xf3   :  { %v362_v59 = vmul.f32 %v2035_v58, %v345_v50  ;;  %vm367_vm4 = vweird.f32 %v2035_v58  ;;  %v2037_v18 = vpop.eup %2036 }
  0xf4   :  { %vm368_vm6 = vmor %vm366_vm5, %vm367_vm4 }
  0xf5   :  { %v363_v1 = vsub.f32 1.0, %v362_v59 }
  0xf7   :  { %v364_v4 = vmul.f32 %v2035_v58, %v363_v1 }
  0xf9   :  { %v365_v9 = vadd.f32 %v2035_v58, %v364_v4 }
  0xfb   :  { %v369_v13 = vsel %vm368_vm6, %v2035_v58, %v365_v9 }
  0xfc   :  { %v374_v15 = vsel %vm371_vm7, %v373_v11, %v369_v13  ;;  %v390_v13 = vld [vmem:[#allocation3 + $0x28] sm:$0xff] }
  0xfd   :  { %v383_v17 = vsub.f32 1.0, %v374_v15  ;;  %v385_v21 = vmul.f32 %v374_v15, %v2503_v61  ;;  %v389_v61 = vld [vmem:[#allocation3 + $0x20] sm:$0xff] }
  0xff   :  { %v384_v20 = vmul.f32 %v2037_v18, %v383_v17 }
 0x101   :  { %v2589_v22 = vadd.f32 %v385_v21, %v384_v20 }
 0x103   :  { %v391_v23 = vpack.c.bf16 %v2589_v22, %v2589_v22 }
 0x105   :  { %400 = vmatmul.bf16.vlgmr.msra.gmra.mxu3 %v391_v23  ;;  %413 = vmatmul.bf16.vlgmr.msra.gmra.mxu0 %v391_v23 }
 0x106   :  { %426 = vmatmul.bf16.vlgmr.msra.gmra.mxu1 %v391_v23  ;;  %602 = vmatpush.bf16.msra.mxu3 %v2448_v10 }
 0x107   :  { %668 = vmatpush.bf16.msra.mxu0 %v2442_v3  ;;  %681 = vmatpush.bf16.msra.mxu1 %v2456_v19 }
 0x10a   :  { %603 = vmatpush.bf16.msra.mxu3 %v2454_v16 }
 0x10b   :  { %669 = vmatpush.bf16.msra.mxu0 %v2445_v5  ;;  %682 = vmatpush.bf16.msra.mxu1 %v2466_v29 }
 0x10e   :  { %604 = vmatpush.bf16.msra.mxu3 %v2464_v27 }
 0x10f   :  { %670 = vmatpush.bf16.msra.mxu0 %v2451_v14  ;;  %683 = vmatpush.bf16.msra.mxu1 %v2476_v37 }
 0x112   :  { %605 = vmatpush.bf16.msra.mxu3 %v2474_v35 }
 0x113   :  { %671 = vmatpush.bf16.msra.mxu0 %v2461_v24  ;;  %684 = vmatpush.bf16.msra.mxu1 %v2486_v46 }
 0x116   :  { %606 = vmatpush.bf16.msra.mxu3 %v2484_v44 }
 0x117   :  { %672 = vmatpush.bf16.msra.mxu0 %v2471_v33  ;;  %685 = vmatpush.bf16.msra.mxu1 %v2496_v55 }
 0x11a   :  { %607 = vmatpush.bf16.msra.mxu3 %v2494_v53 }
 0x11b   :  { %673 = vmatpush.bf16.msra.mxu0 %v2481_v42  ;;  %686 = vmatpush.bf16.msra.mxu1 %v2508_v63 }
 0x11e   :  { %608 = vmatpush.bf16.msra.mxu3 %v2506_v62 }
 0x11f   :  { %674 = vmatpush.bf16.msra.mxu0 %v2491_v51  ;;  %687 = vmatpush.bf16.msra.mxu1 %v2519_v8 }
 0x122   :  { %609 = vmatpush.bf16.msra.mxu3 %v2516_v7 }
 0x123   :  { %675 = vmatpush.bf16.msra.mxu0 %v2501_v60  ;;  %688 = vmatpush.bf16.msra.mxu1 %v2526_v12 }
 0x182   :  { %v414_v25 = vpop.f32.mrf.mxu0 }
 0x183   :  { %v432_v26 = vadd.f32 %v414_v25, %v389_v61  ;;  %v427_v28 = vpop.f32.mrf.mxu1 }
 0x184   :  { %v471_v6 = vadd.f32 %v2585_v45, %v427_v28 }
 0x185   :  { %v1764_v30 = vmul.f32 -1.442695, %v432_v26 }
 0x187   :  { %2038 = vpow2.f32 %v1764_v30 }
 0x188   :  { %v401_v32 = vpop.f32.mrf.mxu3 }
 0x189   :  { %v431_v34 = vadd.f32 %v401_v32, %v388_v31 }
 0x18a   :  { %v416_v36 = vpop.f32.mrf.mxu0 }
 0x18b   :  { %v1763_v38 = vmul.f32 -1.442695, %v431_v34  ;;  %v429_v39 = vpop.f32.mrf.mxu1 }
 0x18c   :  { %v481_v39 = vld [vmem:[#allocation3 + $0x38] sm:$0xff] }
 0x18d   :  { %v2039_v40 = vpop.eup %2038  ;;  %2040 = vpow2.f32 %v1763_v38  ;;  %v480_v38 = vld [vmem:[#allocation3 + $0x30] sm:$0xff] }
 0x18e   :  { %v440_v41 = vadd.f32 1.0, %v2039_v40 }
 0x190   :  { %v403_v43 = vpop.f32.mrf.mxu3  ;;  %2042 = vrcp.f32 %v440_v41  ;;  %v467_v17 = vand.u32 2147483648, %v440_v41  ;;  %vm461_vm13 = vweird.f32 %v440_v41  ;;  %v465_v20 = vand.u32 2147483647, %v440_v41 }
 0x192   :  { %v468_v61 = vor.u32 1.1754944e-38, %v467_v17  ;;  %vm466_vm15 = vcmp.eq.f32.partialorder %v465_v20, 8.507059e+37 }
 0x193   :  { %v2041_v47 = vpop.eup %2040 }
 0x194   :  { %v439_v48 = vadd.f32 1.0, %v2041_v47 }
 0x196   :  { %2044 = vrcp.f32 %v439_v48  ;;  %v2043_v49 = vpop.eup %2042  ;;  %v452_v58 = vand.u32 2147483648, %v439_v48  ;;  %v450_v0 = vand.u32 2147483647, %v439_v48  ;;  %vm446_vm9 = vweird.f32 %v439_v48 }
 0x197   :  { %v457_v50 = vmul.f32 %v2043_v49, %v440_v41  ;;  %vm462_vm12 = vweird.f32 %v2043_v49 }
 0x198   :  { %v453_v4 = vor.u32 1.1754944e-38, %v452_v58  ;;  %vm451_vm11 = vcmp.eq.f32.partialorder %v450_v0, 8.507059e+37  ;;  %vm463_vm14 = vmor %vm461_vm13, %vm462_vm12 }
 0x199   :  { %v458_v56 = vsub.f32 1.0, %v457_v50 }
 0x19b   :  { %v459_v1 = vmul.f32 %v2043_v49, %v458_v56 }
 0x19c   :  { %v2045_v52 = vpop.eup %2044 }
 0x19d   :  { %v442_v54 = vmul.f32 %v2045_v52, %v439_v48  ;;  %vm447_vm8 = vweird.f32 %v2045_v52  ;;  %v460_v15 = vadd.f32 %v2043_v49, %v459_v1 }
 0x19e   :  { %vm448_vm10 = vmor %vm446_vm9, %vm447_vm8 }
 0x19f   :  { %v443_v57 = vsub.f32 1.0, %v442_v54  ;;  %v464_v23 = vsel %vm463_vm14, %v2043_v49, %v460_v15 }
 0x1a0   :  { %v469_v25 = vsel %vm466_vm15, %v468_v61, %v464_v23 }
 0x1a1   :  { %v444_v59 = vmul.f32 %v2045_v52, %v443_v57  ;;  %v475_v26 = vsub.f32 1.0, %v469_v25  ;;  %v477_v31 = vmul.f32 %v469_v25, %v2589_v22 }
 0x1a3   :  { %v445_v2 = vadd.f32 %v2045_v52, %v444_v59 }
 0x1a5   :  { %v449_v9 = vsel %vm448_vm10, %v2045_v52, %v445_v2 }
 0x1a6   :  { %v454_v11 = vsel %vm451_vm11, %v453_v4, %v449_v9 }
 0x1a7   :  { %v472_v18 = vmul.f32 %v471_v6, %v454_v11 }
 0x1a9   :  { %v473_v21 = vadd.f32 %v472_v18, %v390_v13 }
 0x1ab   :  { %2046 = vtanh.f32 %v473_v21 }
 0x1b1   :  { %v2047_v30 = vpop.eup %2046 }
 0x1b2   :  { %v476_v28 = vmul.f32 %v2047_v30, %v475_v26  ;;  %v482_v26 = vld [vmem:[#allocation3 + $0x40] sm:$0xff] }
 0x1b4   :  { %v2619_v32 = vadd.f32 %v477_v31, %v476_v28 }
 0x1b6   :  { %v483_v34 = vpack.c.bf16 %v2619_v32, %v2619_v32 }
 0x1b8   :  { %492 = vmatmul.bf16.vlgmr.msrb.gmra.mxu2 %v483_v34  ;;  %505 = vmatmul.bf16.vlgmr.msrb.gmra.mxu3 %v483_v34 }
 0x1b9   :  { %518 = vmatmul.bf16.vlgmr.msrb.gmra.mxu0 %v483_v34  ;;  %694 = vmatpush.bf16.msrb.mxu2 %v2448_v10 }
 0x1ba   :  { %760 = vmatpush.bf16.msrb.mxu3 %v2442_v3  ;;  %773 = vmatpush.bf16.msrb.mxu0 %v2456_v19 }
 0x1bd   :  { %695 = vmatpush.bf16.msrb.mxu2 %v2454_v16 }
 0x1be   :  { %761 = vmatpush.bf16.msrb.mxu3 %v2445_v5  ;;  %774 = vmatpush.bf16.msrb.mxu0 %v2466_v29 }
 0x1c1   :  { %696 = vmatpush.bf16.msrb.mxu2 %v2464_v27 }
 0x1c2   :  { %762 = vmatpush.bf16.msrb.mxu3 %v2451_v14  ;;  %775 = vmatpush.bf16.msrb.mxu0 %v2476_v37 }
 0x1c5   :  { %697 = vmatpush.bf16.msrb.mxu2 %v2474_v35 }
 0x1c6   :  { %763 = vmatpush.bf16.msrb.mxu3 %v2461_v24  ;;  %776 = vmatpush.bf16.msrb.mxu0 %v2486_v46 }
 0x1c9   :  { %698 = vmatpush.bf16.msrb.mxu2 %v2484_v44 }
 0x1ca   :  { %764 = vmatpush.bf16.msrb.mxu3 %v2471_v33  ;;  %777 = vmatpush.bf16.msrb.mxu0 %v2496_v55 }
 0x1cd   :  { %699 = vmatpush.bf16.msrb.mxu2 %v2494_v53 }
 0x1ce   :  { %765 = vmatpush.bf16.msrb.mxu3 %v2481_v42  ;;  %778 = vmatpush.bf16.msrb.mxu0 %v2508_v63 }
 0x1d1   :  { %700 = vmatpush.bf16.msrb.mxu2 %v2506_v62 }
 0x1d2   :  { %766 = vmatpush.bf16.msrb.mxu3 %v2491_v51  ;;  %779 = vmatpush.bf16.msrb.mxu0 %v2519_v8 }
 0x1d5   :  { %701 = vmatpush.bf16.msrb.mxu2 %v2516_v7 }
 0x1d6   :  { %767 = vmatpush.bf16.msrb.mxu3 %v2501_v60  ;;  %780 = vmatpush.bf16.msrb.mxu0 %v2526_v12 }
 0x236   :  { %v519_v36 = vpop.f32.mrf.mxu0 }
 0x237   :  { %v563_v21 = vadd.f32 %v2585_v45, %v519_v36 }
 0x23b   :  { %v493_v40 = vpop.f32.mrf.mxu2  ;;  %v506_v41 = vpop.f32.mrf.mxu3 }
 0x23c   :  { %v523_v43 = vadd.f32 %v493_v40, %v480_v38  ;;  %v524_v47 = vadd.f32 %v506_v41, %v481_v39 }
 0x23e   :  { %v1765_v48 = vmul.f32 -1.442695, %v523_v43  ;;  %v1766_v49 = vmul.f32 -1.442695, %v524_v47  ;;  %v521_v50 = vpop.f32.mrf.mxu0 }
 0x23f   :  { %v572_v50 = vld [vmem:[#allocation3 + $0x48] sm:$0xff] }
 0x240   :  { %2048 = vpow2.f32 %v1765_v48 }
 0x241   :  { %2050 = vpow2.f32 %v1766_v49 }
 0x243   :  { %v495_v52 = vpop.f32.mrf.mxu2  ;;  %v508_v54 = vpop.f32.mrf.mxu3 }
 0x246   :  { %v2049_v56 = vpop.eup %2048 }
 0x247   :  { %v2051_v57 = vpop.eup %2050  ;;  %v531_v58 = vadd.f32 1.0, %v2049_v56 }
 0x248   :  { %v532_v59 = vadd.f32 1.0, %v2051_v57  ;;  %v573_v57 = vld [vmem:[#allocation3 + $0x50] sm:$0xff] }
 0x249   :  { %2052 = vrcp.f32 %v531_v58  ;;  %v544_v9 = vand.u32 2147483648, %v531_v58  ;;  %v542_v15 = vand.u32 2147483647, %v531_v58  ;;  %vm538_vm1 = vweird.f32 %v531_v58 }
 0x24a   :  { %2054 = vrcp.f32 %v532_v59  ;;  %v559_v28 = vand.u32 2147483648, %v532_v59  ;;  %vm553_vm5 = vweird.f32 %v532_v59  ;;  %v557_v31 = vand.u32 2147483647, %v532_v59 }
 0x24b   :  { %v545_v20 = vor.u32 1.1754944e-38, %v544_v9  ;;  %vm543_vm3 = vcmp.eq.f32.partialorder %v542_v15, 8.507059e+37 }
 0x24c   :  { %v560_v39 = vor.u32 1.1754944e-38, %v559_v28  ;;  %vm558_vm7 = vcmp.eq.f32.partialorder %v557_v31, 8.507059e+37 }
 0x24f   :  { %v2053_v0 = vpop.eup %2052 }
 0x250   :  { %v2055_v1 = vpop.eup %2054  ;;  %v534_v2 = vmul.f32 %v2053_v0, %v531_v58  ;;  %vm539_vm0 = vweird.f32 %v2053_v0 }
 0x251   :  { %v549_v4 = vmul.f32 %v2055_v1, %v532_v59  ;;  %vm540_vm2 = vmor %vm538_vm1, %vm539_vm0  ;;  %vm554_vm4 = vweird.f32 %v2055_v1 }
 0x252   :  { %v535_v6 = vsub.f32 1.0, %v534_v2  ;;  %vm555_vm6 = vmor %vm553_vm5, %vm554_vm4 }
 0x253   :  { %v550_v11 = vsub.f32 1.0, %v549_v4 }
 0x254   :  { %v536_v13 = vmul.f32 %v2053_v0, %v535_v6 }
 0x255   :  { %v551_v17 = vmul.f32 %v2055_v1, %v550_v11 }
 0x256   :  { %v537_v18 = vadd.f32 %v2053_v0, %v536_v13 }
 0x257   :  { %v552_v25 = vadd.f32 %v2055_v1, %v551_v17 }
 0x258   :  { %v541_v23 = vsel %vm540_vm2, %v2053_v0, %v537_v18 }
 0x259   :  { %v546_v61 = vsel %vm543_vm3, %v545_v20, %v541_v23  ;;  %v556_v38 = vsel %vm555_vm6, %v2055_v1, %v552_v25 }
 0x25a   :  { %v564_v30 = vmul.f32 %v563_v21, %v546_v61  ;;  %v561_v40 = vsel %vm558_vm7, %v560_v39, %v556_v38  ;;  %v574_v39 = vld [vmem:[#allocation3 + $0x58] sm:$0xff] }
 0x25b   :  { %v567_v41 = vsub.f32 1.0, %v561_v40  ;;  %v569_v47 = vmul.f32 %v561_v40, %v2619_v32 }
 0x25c   :  { %v565_v34 = vadd.f32 %v564_v30, %v482_v26 }
 0x25e   :  { %2056 = vtanh.f32 %v565_v34 }
 0x264   :  { %v2057_v43 = vpop.eup %2056 }
 0x265   :  { %v568_v36 = vmul.f32 %v2057_v43, %v567_v41 }
 0x267   :  { %v2649_v48 = vadd.f32 %v569_v47, %v568_v36 }
 0x269   :  { %v575_v49 = vpack.c.bf16 %v2649_v48, %v2649_v48 }
 0x26b   :  { %584 = vmatmul.bf16.vlgmr.msrb.gmra.mxu1 %v575_v49  ;;  %597 = vmatmul.bf16.vlgmr.msra.gmra.mxu2 %v575_v49 }
 0x26c   :  { %610 = vmatmul.bf16.vlgmr.msra.gmra.mxu3 %v575_v49  ;;  %786 = vmatpush.bf16.msrb.mxu1 %v2448_v10 }
 0x26d   :  { %852 = vmatpush.bf16.msra.mxu2 %v2442_v3  ;;  %865 = vmatpush.bf16.msra.mxu3 %v2456_v19 }
 0x270   :  { %787 = vmatpush.bf16.msrb.mxu1 %v2454_v16 }
 0x271   :  { %853 = vmatpush.bf16.msra.mxu2 %v2445_v5  ;;  %866 = vmatpush.bf16.msra.mxu3 %v2466_v29 }
 0x274   :  { %788 = vmatpush.bf16.msrb.mxu1 %v2464_v27 }
 0x275   :  { %854 = vmatpush.bf16.msra.mxu2 %v2451_v14  ;;  %867 = vmatpush.bf16.msra.mxu3 %v2476_v37 }
 0x278   :  { %789 = vmatpush.bf16.msrb.mxu1 %v2474_v35 }
 0x279   :  { %855 = vmatpush.bf16.msra.mxu2 %v2461_v24  ;;  %868 = vmatpush.bf16.msra.mxu3 %v2486_v46 }
 0x27c   :  { %790 = vmatpush.bf16.msrb.mxu1 %v2484_v44 }
 0x27d   :  { %856 = vmatpush.bf16.msra.mxu2 %v2471_v33  ;;  %869 = vmatpush.bf16.msra.mxu3 %v2496_v55 }
 0x280   :  { %791 = vmatpush.bf16.msrb.mxu1 %v2494_v53 }
 0x281   :  { %857 = vmatpush.bf16.msra.mxu2 %v2481_v42  ;;  %870 = vmatpush.bf16.msra.mxu3 %v2508_v63 }
 0x284   :  { %792 = vmatpush.bf16.msrb.mxu1 %v2506_v62 }
 0x285   :  { %858 = vmatpush.bf16.msra.mxu2 %v2491_v51  ;;  %871 = vmatpush.bf16.msra.mxu3 %v2519_v8 }
 0x288   :  { %793 = vmatpush.bf16.msrb.mxu1 %v2516_v7 }
 0x289   :  { %859 = vmatpush.bf16.msra.mxu2 %v2501_v60  ;;  %872 = vmatpush.bf16.msra.mxu3 %v2526_v12 }
 0x2e8   :  { %v585_v52 = vpop.f32.mrf.mxu1 }
 0x2e9   :  { %v615_v54 = vadd.f32 %v585_v52, %v572_v50 }
 0x2eb   :  { %v1767_v56 = vmul.f32 -1.442695, %v615_v54 }
 0x2ed   :  { %2058 = vpow2.f32 %v1767_v56 }
 0x2ee   :  { %v598_v58 = vpop.f32.mrf.mxu2 }
 0x2ef   :  { %v616_v59 = vadd.f32 %v598_v58, %v573_v57  ;;  %v611_v0 = vpop.f32.mrf.mxu3 }
 0x2f0   :  { %v587_v1 = vpop.f32.mrf.mxu1  ;;  %v655_v38 = vadd.f32 %v2585_v45, %v611_v0 }
 0x2f1   :  { %v1768_v2 = vmul.f32 -1.442695, %v616_v59 }
 0x2f3   :  { %v2059_v4 = vpop.eup %2058  ;;  %2060 = vpow2.f32 %v1768_v2 }
 0x2f4   :  { %v623_v6 = vadd.f32 1.0, %v2059_v4 }
 0x2f6   :  { %2062 = vrcp.f32 %v623_v6  ;;  %v600_v9 = vpop.f32.mrf.mxu2  ;;  %v636_v21 = vand.u32 2147483648, %v623_v6  ;;  %v634_v61 = vand.u32 2147483647, %v623_v6  ;;  %vm630_vm9 = vweird.f32 %v623_v6 }
 0x2f7   :  { %v613_v11 = vpop.f32.mrf.mxu3 }
 0x2f8   :  { %v637_v28 = vor.u32 1.1754944e-38, %v636_v21  ;;  %vm635_vm11 = vcmp.eq.f32.partialorder %v634_v61, 8.507059e+37 }
 0x2f9   :  { %v2061_v13 = vpop.eup %2060 }
 0x2fa   :  { %v624_v15 = vadd.f32 1.0, %v2061_v13 }
 0x2fc   :  { %v2063_v17 = vpop.eup %2062  ;;  %2064 = vrcp.f32 %v624_v15  ;;  %v651_v43 = vand.u32 2147483648, %v624_v15  ;;  %v649_v47 = vand.u32 2147483647, %v624_v15  ;;  %vm645_vm13 = vweird.f32 %v624_v15 }
 0x2fd   :  { %v626_v18 = vmul.f32 %v2063_v17, %v623_v6  ;;  %vm631_vm8 = vweird.f32 %v2063_v17 }
 0x2fe   :  { %vm632_vm10 = vmor %vm630_vm9, %vm631_vm8  ;;  %v652_v52 = vor.u32 1.1754944e-38, %v651_v43  ;;  %vm650_vm15 = vcmp.eq.f32.partialorder %v649_v47, 8.507059e+37 }
 0x2ff   :  { %v627_v20 = vsub.f32 1.0, %v626_v18 }
 0x301   :  { %v628_v23 = vmul.f32 %v2063_v17, %v627_v20 }
 0x302   :  { %v2065_v25 = vpop.eup %2064 }
 0x303   :  { %v641_v26 = vmul.f32 %v2065_v25, %v624_v15  ;;  %v629_v30 = vadd.f32 %v2063_v17, %v628_v23  ;;  %vm646_vm12 = vweird.f32 %v2065_v25 }
 0x304   :  { %vm647_vm14 = vmor %vm645_vm13, %vm646_vm12 }
 0x305   :  { %v642_v31 = vsub.f32 1.0, %v641_v26  ;;  %v633_v34 = vsel %vm632_vm10, %v2063_v17, %v629_v30 }
 0x306   :  { %v638_v40 = vsel %vm635_vm11, %v637_v28, %v633_v34  ;;  %v666_v28 = vld [vmem:[#allocation3 + $0x70] sm:$0xff] }
 0x307   :  { %v643_v41 = vmul.f32 %v2065_v25, %v642_v31  ;;  %v656_v36 = vmul.f32 %v655_v38, %v638_v40 }
 0x309   :  { %v644_v49 = vadd.f32 %v2065_v25, %v643_v41  ;;  %v657_v50 = vadd.f32 %v656_v36, %v574_v39 }
 0x30b   :  { %v648_v54 = vsel %vm647_vm14, %v2065_v25, %v644_v49  ;;  %2066 = vtanh.f32 %v657_v50 }
 0x30c   :  { %v653_v56 = vsel %vm650_vm15, %v652_v52, %v648_v54 }
 0x30d   :  { %v659_v57 = vsub.f32 1.0, %v653_v56  ;;  %v661_v0 = vmul.f32 %v653_v56, %v2649_v48 }
 0x311   :  { %v2067_v58 = vpop.eup %2066 }
 0x312   :  { %v660_v59 = vmul.f32 %v2067_v58, %v659_v57  ;;  %v757_v57 = vld [vmem:[#allocation3 + $0x80] sm:$0xff] }
 0x314   :  { %v2679_v1 = vadd.f32 %v661_v0, %v660_v59 }
 0x316   :  { %v667_v2 = vpack.c.bf16 %v2679_v1, %v2679_v1 }
 0x318   :  { %676 = vmatmul.bf16.vlgmr.msra.gmra.mxu0 %v667_v2  ;;  %689 = vmatmul.bf16.vlgmr.msra.gmra.mxu1 %v667_v2 }
 0x319   :  { %702 = vmatmul.bf16.vlgmr.msrb.gmra.mxu2 %v667_v2  ;;  %878 = vmatpush.bf16.msra.mxu0 %v2448_v10  ;;  %v756_v2 = vld [vmem:[#allocation3 + $0x78] sm:$0xff] }
 0x31a   :  { %944 = vmatpush.bf16.msra.mxu1 %v2442_v3  ;;  %957 = vmatpush.bf16.msrb.mxu2 %v2456_v19  ;;  %v664_v3 = vld [vmem:[#allocation3 + $0x60] sm:$0xff] }
 0x31d   :  { %879 = vmatpush.bf16.msra.mxu0 %v2454_v16 }
 0x31e   :  { %945 = vmatpush.bf16.msra.mxu1 %v2445_v5  ;;  %958 = vmatpush.bf16.msrb.mxu2 %v2466_v29  ;;  %v665_v5 = vld [vmem:[#allocation3 + $0x68] sm:$0xff] }
 0x321   :  { %880 = vmatpush.bf16.msra.mxu0 %v2464_v27 }
 0x322   :  { %946 = vmatpush.bf16.msra.mxu1 %v2451_v14  ;;  %959 = vmatpush.bf16.msrb.mxu2 %v2476_v37 }
 0x325   :  { %881 = vmatpush.bf16.msra.mxu0 %v2474_v35 }
 0x326   :  { %947 = vmatpush.bf16.msra.mxu1 %v2461_v24  ;;  %960 = vmatpush.bf16.msrb.mxu2 %v2486_v46 }
 0x329   :  { %882 = vmatpush.bf16.msra.mxu0 %v2484_v44 }
 0x32a   :  { %948 = vmatpush.bf16.msra.mxu1 %v2471_v33  ;;  %961 = vmatpush.bf16.msrb.mxu2 %v2496_v55 }
 0x32d   :  { %883 = vmatpush.bf16.msra.mxu0 %v2494_v53 }
 0x32e   :  { %949 = vmatpush.bf16.msra.mxu1 %v2481_v42  ;;  %962 = vmatpush.bf16.msrb.mxu2 %v2508_v63 }
 0x331   :  { %884 = vmatpush.bf16.msra.mxu0 %v2506_v62 }
 0x332   :  { %950 = vmatpush.bf16.msra.mxu1 %v2491_v51  ;;  %963 = vmatpush.bf16.msrb.mxu2 %v2519_v8 }
 0x335   :  { %885 = vmatpush.bf16.msra.mxu0 %v2516_v7 }
 0x336   :  { %951 = vmatpush.bf16.msra.mxu1 %v2501_v60  ;;  %964 = vmatpush.bf16.msrb.mxu2 %v2526_v12 }
 0x395   :  { %v677_v14 = vpop.f32.mrf.mxu0  ;;  %v690_v19 = vpop.f32.mrf.mxu1 }
 0x396   :  { %v707_v24 = vadd.f32 %v677_v14, %v664_v3  ;;  %v708_v29 = vadd.f32 %v690_v19, %v665_v5  ;;  %v1827_v3 = vld [vmem:[#allocation9 + $0x60] sm:$0xf] }
 0x398   :  { %v1769_v33 = vmul.f32 -1.442695, %v707_v24  ;;  %v1770_v37 = vmul.f32 -1.442695, %v708_v29  ;;  %v1819_v24 = vld [vmem:[#allocation9 + $0x50] sm:$0xf] }
 0x399   :  { %v1972_v29 = vld [vmem:[#allocation9 + $0x54] sm:$0xf0] }
 0x39a   :  { %2068 = vpow2.f32 %v1769_v33 }
 0x39b   :  { %2070 = vpow2.f32 %v1770_v37 }
 0x39c   :  { %v703_v42 = vpop.f32.mrf.mxu2 }
 0x39d   :  { %v679_v46 = vpop.f32.mrf.mxu0  ;;  %v692_v51 = vpop.f32.mrf.mxu1  ;;  %v747_v26 = vadd.f32 %v2585_v45, %v703_v42  ;;  %v1820_v42 = vor.u32 %v1972_v29, %v1819_v24  ;;  %v1984_v24 = vld [vmem:[#allocation11 + $0x38] sm:$0xff] }
 0x39e   :  { %v1811_v46 = vld [vmem:[#allocation9 + $0x40] sm:$0xf]  ;;  %v1970_v51 = vld [vmem:[#allocation9 + $0x44] sm:$0xf0] }
 0x3a0   :  { %v2069_v55 = vpop.eup %2068 }
 0x3a1   :  { %v2071_v63 = vpop.eup %2070  ;;  %v715_v8 = vadd.f32 1.0, %v2069_v55 }
 0x3a2   :  { %v716_v4 = vadd.f32 1.0, %v2071_v63  ;;  %v1812_v63 = vor.u32 %v1970_v51, %v1811_v46  ;;  %v1973_v51 = vld [vmem:[#allocation9 + $0x64] sm:$0xf] }
 0x3a3   :  { %2072 = vrcp.f32 %v715_v8  ;;  %v728_v17 = vand.u32 2147483648, %v715_v8  ;;  %v726_v20 = vand.u32 2147483647, %v715_v8  ;;  %vm722_vm1 = vweird.f32 %v715_v8 }
 0x3a4   :  { %2074 = vrcp.f32 %v716_v4  ;;  %v705_v60 = vpop.f32.mrf.mxu2  ;;  %v743_v34 = vand.u32 2147483648, %v716_v4  ;;  %vm737_vm5 = vweird.f32 %v716_v4  ;;  %v741_v39 = vand.u32 2147483647, %v716_v4 }
 0x3a5   :  { %v729_v61 = vor.u32 1.1754944e-38, %v728_v17  ;;  %vm727_vm3 = vcmp.eq.f32.partialorder %v726_v20, 8.507059e+37  ;;  %v1964_v20 = vld [vmem:[#allocation9 + $0x14] sm:$0xf0] }
 0x3a6   :  { %v744_v43 = vor.u32 1.1754944e-38, %v743_v34  ;;  %vm742_vm7 = vcmp.eq.f32.partialorder %v741_v39, 8.507059e+37 }
 0x3a9   :  { %v2073_v12 = vpop.eup %2072 }
 0x3aa   :  { %v2075_v6 = vpop.eup %2074  ;;  %v718_v9 = vmul.f32 %v2073_v12, %v715_v8  ;;  %vm723_vm0 = vweird.f32 %v2073_v12 }
 0x3ab   :  { %v733_v11 = vmul.f32 %v2075_v6, %v716_v4  ;;  %vm724_vm2 = vmor %vm722_vm1, %vm723_vm0  ;;  %vm738_vm4 = vweird.f32 %v2075_v6 }
 0x3ac   :  { %v719_v13 = vsub.f32 1.0, %v718_v9  ;;  %vm739_vm6 = vmor %vm737_vm5, %vm738_vm4 }
 0x3ad   :  { %v734_v15 = vsub.f32 1.0, %v733_v11  ;;  %v1795_v11 = vld [vmem:[#allocation9 + $0x20] sm:$0xf] }
 0x3ae   :  { %v720_v18 = vmul.f32 %v2073_v12, %v719_v13  ;;  %v1966_v13 = vld [vmem:[#allocation9 + $0x24] sm:$0xf0] }
 0x3af   :  { %v735_v21 = vmul.f32 %v2075_v6, %v734_v15  ;;  %v1796_v17 = vor.u32 %v1966_v13, %v1795_v11  ;;  %v1982_v11 = vld [vmem:[#allocation11 + $0x28] sm:$0xff] }
 0x3b0   :  { %v721_v23 = vadd.f32 %v2073_v12, %v720_v18  ;;  %v1787_v18 = vld [vmem:[#allocation9 + $0x10] sm:$0xf] }
 0x3b1   :  { %v736_v30 = vadd.f32 %v2075_v6, %v735_v21 }
 0x3b2   :  { %v725_v25 = vsel %vm724_vm2, %v2073_v12, %v721_v23  ;;  %v1803_v12 = vld [vmem:[#allocation9 + $0x30] sm:$0xf] }
 0x3b3   :  { %v730_v31 = vsel %vm727_vm3, %v729_v61, %v725_v25  ;;  %v740_v41 = vsel %vm739_vm6, %v2075_v6, %v736_v30  ;;  %v1968_v6 = vld [vmem:[#allocation9 + $0x34] sm:$0xf0]  ;;  %v1788_v25 = vor.u32 %v1964_v20, %v1787_v18  ;;  %v1779_v30 = vld [vmem:[#allocation9] sm:$0xf]  ;;  %v1969_v20 = vld [vmem:[#allocation9 + $0x44] sm:$0xf] }
 0x3b4   :  { %v748_v38 = vmul.f32 %v747_v26, %v730_v31  ;;  %v745_v36 = vsel %vm742_vm7, %v744_v43, %v740_v41  ;;  %v1804_v9 = vor.u32 %v1968_v6, %v1803_v12 }
 0x3b5   :  { %v751_v47 = vsub.f32 1.0, %v745_v36  ;;  %v753_v52 = vmul.f32 %v745_v36, %v2679_v1 }
 0x3b6   :  { %v749_v40 = vadd.f32 %v748_v38, %v666_v28  ;;  %v1962_v28 = vld [vmem:[#allocation9 + $0x4] sm:$0xf0] }
 0x3b8   :  { %2076 = vtanh.f32 %v749_v40  ;;  %v1780_v40 = vor.u32 %v1962_v28, %v1779_v30  ;;  %v1980_v28 = vld [vmem:[#allocation11 + $0x18] sm:$0xff] }
 0x3be   :  { %v2077_v49 = vpop.eup %2076 }
 0x3bf   :  { %v752_v50 = vmul.f32 %v2077_v49, %v751_v47 }
 0x3c1   :  { %v2709_v54 = vadd.f32 %v753_v52, %v752_v50  ;;  %v758_v52 = vld [vmem:[#allocation3 + $0x88] sm:$0xff] }
 0x3c3   :  { %v759_v56 = vpack.c.bf16 %v2709_v54, %v2709_v54 }
 0x3c5   :  { %768 = vmatmul.bf16.vlgmr.msrb.gmra.mxu3 %v759_v56  ;;  %781 = vmatmul.bf16.vlgmr.msrb.gmra.mxu0 %v759_v56 }
 0x3c6   :  { %794 = vmatmul.bf16.vlgmr.msrb.gmra.mxu1 %v759_v56  ;;  %970 = vmatpush.bf16.msrb.mxu3 %v2448_v10 }
 0x3ca   :  { %971 = vmatpush.bf16.msrb.mxu3 %v2454_v16  ;;  %v1835_v16 = vld [vmem:[#allocation9 + $0x70] sm:$0xf] }
 0x3ce   :  { %972 = vmatpush.bf16.msrb.mxu3 %v2464_v27  ;;  %v1976_v27 = vld [vmem:[#allocation9 + $0x74] sm:$0xf0] }
 0x3cf   :  { %v1836_v5 = vor.u32 %v1976_v27, %v1835_v16 }
 0x3d1   :  { %1147 = vmatpush.bf16.msrb.mxu0 %v1836_v5 }
 0x3d2   :  { %973 = vmatpush.bf16.msrb.mxu3 %v2474_v35 }
 0x3d6   :  { %974 = vmatpush.bf16.msrb.mxu3 %v2484_v44  ;;  %v1974_v44 = vld [vmem:[#allocation9 + $0x64] sm:$0xf0] }
 0x3da   :  { %975 = vmatpush.bf16.msrb.mxu3 %v2494_v53 }
 0x3de   :  { %976 = vmatpush.bf16.msrb.mxu3 %v2506_v62  ;;  %v1828_v62 = vor.u32 %v1974_v44, %v1827_v3  ;;  %v2732_v44 = vpack.c.bf16 %v2619_v32, %v2589_v22  ;;  %v1975_v22 = vld [vmem:[#allocation9 + $0x74] sm:$0xf]  ;;  %v1837_v32 = vld [vmem:[#allocation9 + $0x78] sm:$0xf0] }
 0x3e0   :  { %1148 = vmatpush.bf16.msrb.mxu0 %v1828_v62 }
 0x3e2   :  { %977 = vmatpush.bf16.msrb.mxu3 %v2516_v7 }
 0x3e4   :  { %1149 = vmatpush.bf16.msrb.mxu0 %v1820_v42 }
 0x3e8   :  { %1150 = vmatpush.bf16.msrb.mxu0 %v1812_v63 }
 0x3ec   :  { %1151 = vmatpush.bf16.msrb.mxu0 %v1804_v9 }
 0x3f0   :  { %1152 = vmatpush.bf16.msrb.mxu0 %v1796_v17 }
 0x3f4   :  { %1153 = vmatpush.bf16.msrb.mxu0 %v1788_v25  ;;  %v1967_v25 = vld [vmem:[#allocation9 + $0x34] sm:$0xf] }
 0x3f8   :  { %1154 = vmatpush.bf16.msrb.mxu0 %v1780_v40  ;;  %v1797_v40 = vld [vmem:[#allocation9 + $0x28] sm:$0xf0] }
 0x442   :  { %v782_v58 = vpop.f32.mrf.mxu0 }
 0x443   :  { %v800_v59 = vadd.f32 %v782_v58, %v757_v57  ;;  %v2721_v0 = vpop.f32.mrf.mxu1 }
 0x444   :  { %v839_v36 = vadd.f32 %v2585_v45, %v2721_v0 }
 0x445   :  { %v1772_v10 = vmul.f32 -1.442695, %v800_v59 }
 0x447   :  { %2078 = vpow2.f32 %v1772_v10 }
 0x448   :  { %v769_v35 = vpop.f32.mrf.mxu3 }
 0x449   :  { %v799_v14 = vadd.f32 %v769_v35, %v756_v2 }
 0x44a   :  { %v784_v53 = vpop.f32.mrf.mxu0 }
 0x44b   :  { %v1771_v19 = vmul.f32 -1.442695, %v799_v14  ;;  %v797_v7 = vpop.f32.mrf.mxu1  ;;  %v2737_v14 = vpack.c.bf16 %v2679_v1, %v2649_v48 }
 0x44c   :  { %v849_v7 = vld [vmem:[#allocation3 + $0x98] sm:$0xff] }
 0x44d   :  { %v2079_v33 = vpop.eup %2078  ;;  %2080 = vpow2.f32 %v1771_v19  ;;  %v848_v19 = vld [vmem:[#allocation3 + $0x90] sm:$0xff] }
 0x44e   :  { %v808_v37 = vadd.f32 1.0, %v2079_v33 }
 0x450   :  { %v771_v55 = vpop.f32.mrf.mxu3  ;;  %2082 = vrcp.f32 %v808_v37  ;;  %v835_v56 = vand.u32 2147483648, %v808_v37  ;;  %vm829_vm13 = vweird.f32 %v808_v37  ;;  %v833_v58 = vand.u32 2147483647, %v808_v37 }
 0x451   :  { %v1829_v55 = vld [vmem:[#allocation9 + $0x68] sm:$0xf0] }
 0x452   :  { %v836_v2 = vor.u32 1.1754944e-38, %v835_v56  ;;  %vm834_vm15 = vcmp.eq.f32.partialorder %v833_v58, 8.507059e+37  ;;  %v1832_v63 = vor.u32 %v1973_v51, %v1829_v55 }
 0x453   :  { %v2081_v8 = vpop.eup %2080 }
 0x454   :  { %v807_v4 = vadd.f32 1.0, %v2081_v8  ;;  %v1983_v8 = vld [vmem:[#allocation11 + $0x30] sm:$0xff] }
 0x456   :  { %2084 = vrcp.f32 %v807_v4  ;;  %v2083_v60 = vpop.eup %2082  ;;  %v820_v31 = vand.u32 2147483648, %v807_v4  ;;  %v818_v38 = vand.u32 2147483647, %v807_v4  ;;  %vm814_vm9 = vweird.f32 %v807_v4 }
 0x457   :  { %v825_v15 = vmul.f32 %v2083_v60, %v808_v37  ;;  %vm830_vm12 = vweird.f32 %v2083_v60  ;;  %v1840_v37 = vor.u32 %v1975_v22, %v1837_v32 }
 0x458   :  { %v821_v43 = vor.u32 1.1754944e-38, %v820_v31  ;;  %vm819_vm11 = vcmp.eq.f32.partialorder %v818_v38, 8.507059e+37  ;;  %vm831_vm14 = vmor %vm829_vm13, %vm830_vm12 }
 0x459   :  { %v826_v61 = vsub.f32 1.0, %v825_v15  ;;  %1176 = vmatpush.bf16.msrb.mxu1 %v1840_v37 }
 0x45b   :  { %v827_v39 = vmul.f32 %v2083_v60, %v826_v61 }
 0x45c   :  { %v2085_v21 = vpop.eup %2084 }
 0x45d   :  { %v810_v23 = vmul.f32 %v2085_v21, %v807_v4  ;;  %vm815_vm8 = vweird.f32 %v2085_v21  ;;  %v828_v49 = vadd.f32 %v2083_v60, %v827_v39  ;;  %v1971_v4 = vld [vmem:[#allocation9 + $0x54] sm:$0xf]  ;;  %1177 = vmatpush.bf16.msrb.mxu1 %v1832_v63  ;;  %v1965_v39 = vld [vmem:[#allocation9 + $0x24] sm:$0xf] }
 0x45e   :  { %vm816_vm10 = vmor %vm814_vm9, %vm815_vm8 }
 0x45f   :  { %v811_v26 = vsub.f32 1.0, %v810_v23  ;;  %v832_v10 = vsel %vm831_vm14, %v2083_v60, %v828_v49  ;;  %v1821_v60 = vld [vmem:[#allocation9 + $0x58] sm:$0xf0]  ;;  %v1981_v23 = vld [vmem:[#allocation11 + $0x20] sm:$0xff]  ;;  %v1963_v49 = vld [vmem:[#allocation9 + $0x14] sm:$0xf] }
 0x460   :  { %v837_v16 = vsel %vm834_vm15, %v836_v2, %v832_v10  ;;  %v1824_v9 = vor.u32 %v1971_v4, %v1821_v60 }
 0x461   :  { %v812_v34 = vmul.f32 %v2085_v21, %v811_v26  ;;  %v843_v27 = vsub.f32 1.0, %v837_v16  ;;  %v845_v3 = vmul.f32 %v837_v16, %v2709_v54  ;;  %v1805_v26 = vld [vmem:[#allocation9 + $0x38] sm:$0xf0] }
 0x462   :  { %1178 = vmatpush.bf16.msrb.mxu1 %v1824_v9  ;;  %v1808_v30 = vor.u32 %v1967_v25, %v1805_v26 }
 0x463   :  { %v813_v41 = vadd.f32 %v2085_v21, %v812_v34 }
 0x465   :  { %v817_v47 = vsel %vm816_vm10, %v2085_v21, %v813_v41  ;;  %v1813_v21 = vld [vmem:[#allocation9 + $0x48] sm:$0xf0] }
 0x466   :  { %v822_v50 = vsel %vm819_vm11, %v821_v43, %v817_v47  ;;  %v1816_v61 = vor.u32 %v1969_v20, %v1813_v21  ;;  %v1800_v43 = vor.u32 %v1965_v39, %v1797_v40  ;;  %v1992_v40 = vld [vmem:[#allocation11 + $0x78] sm:$0xff] }
 0x467   :  { %v840_v57 = vmul.f32 %v839_v36, %v822_v50  ;;  %v1979_v36 = vld [vmem:[#allocation11 + $0x10] sm:$0xff]  ;;  %v1789_v50 = vld [vmem:[#allocation9 + $0x18] sm:$0xf0] }
 0x468   :  { %1179 = vmatpush.bf16.msrb.mxu1 %v1816_v61  ;;  %v1792_v2 = vor.u32 %v1963_v49, %v1789_v50  ;;  %v1986_v49 = vld [vmem:[#allocation11 + $0x48] sm:$0xff]  ;;  %v1985_v50 = vld [vmem:[#allocation11 + $0x40] sm:$0xff] }
 0x469   :  { %v841_v59 = vadd.f32 %v840_v57, %v758_v52  ;;  %v1978_v57 = vld [vmem:[#allocation11 + $0x8] sm:$0xff] }
 0x46b   :  { %2086 = vtanh.f32 %v841_v59 }
 0x46c   :  { %1180 = vmatpush.bf16.msrb.mxu1 %v1808_v30 }
 0x470   :  { %1181 = vmatpush.bf16.msrb.mxu1 %v1800_v43  ;;  %v1990_v43 = vld [vmem:[#allocation11 + $0x68] sm:$0xff] }
 0x471   :  { %v2087_v45 = vpop.eup %2086 }
 0x472   :  { %v844_v0 = vmul.f32 %v2087_v45, %v843_v27  ;;  %v1961_v27 = vld [vmem:[#allocation9 + $0x4] sm:$0xf]  ;;  %v1781_v45 = vld [vmem:[#allocation9 + $0x8] sm:$0xf0] }
 0x474   :  { %v2726_v35 = vadd.f32 %v845_v3, %v844_v0  ;;  %v1977_v3 = vld [vmem:[#allocation11] sm:$0xff]  ;;  %1182 = vmatpush.bf16.msrb.mxu1 %v1792_v2 }
 0x476   :  { %v851_v5 = vpack.c.bf16 %v2726_v35, %v2726_v35  ;;  %v2742_v53 = vpack.c.bf16 %v2726_v35, %v2709_v54 }
 0x478   :  { %860 = vmatmul.bf16.vlgmr.msra.gmra.mxu2 %v851_v5  ;;  %873 = vmatmul.bf16.vlgmr.msra.gmra.mxu3 %v851_v5 }
 0x479   :  { %886 = vmatmul.bf16.vlgmr.msra.gmra.mxu0 %v851_v5  ;;  %1361 = vmatpush.bf16.msra.mxu2 %v1984_v24  ;;  %v2754_v5 = vld [vmem:[%s2904_s3] ss:$0 sm:$0xff] }
 0x47a   :  { %v850_v24 = vld [vmem:[#allocation3 + $0xa0] sm:$0xff]  ;;  %1390 = vmatpush.bf16.msra.mxu3 %v1992_v40 }
 0x47d   :  { %1362 = vmatpush.bf16.msra.mxu2 %v1983_v8 }
 0x481   :  { %1363 = vmatpush.bf16.msra.mxu2 %v1982_v11 }
 0x485   :  { %1364 = vmatpush.bf16.msra.mxu2 %v1981_v23 }
 0x489   :  { %1155 = vmatmul.bf16.vlgmr.msrb.gmra.mxu0 %v2732_v44  ;;  %1365 = vmatpush.bf16.msra.mxu2 %v1980_v28 }
 0x48d   :  { %1366 = vmatpush.bf16.msra.mxu2 %v1979_v36  ;;  %v1989_v36 = vld [vmem:[#allocation11 + $0x60] sm:$0xff] }
 0x491   :  { %1367 = vmatpush.bf16.msra.mxu2 %v1978_v57 }
 0x495   :  { %1368 = vmatpush.bf16.msra.mxu2 %v1977_v3 }
 0x499   :  { %1160 = vmatmul.bf16.gmra.mxu0 %v2737_v14 }
 0x4a9   :  { %1165 = vmatmul.bf16.gmra.mxu0 %v2742_v53 }
 0x4f6   :  { %v2745_v62 = vpop.f32.mrf.mxu0 }
 0x4fb   :  { %v861_v29 = vpop.f32.mrf.mxu2  ;;  %v874_v33 = vpop.f32.mrf.mxu3 }
 0x4fc   :  { %v891_v48 = vadd.f32 %v861_v29, %v848_v19  ;;  %v892_v1 = vadd.f32 %v874_v33, %v849_v7  ;;  %v931_v19 = vadd.f32 %v2754_v5, %v2745_v62  ;;  %v1784_v29 = vor.u32 %v1961_v27, %v1781_v45 }
 0x4fe   :  { %v1773_v42 = vmul.f32 -1.442695, %v891_v48  ;;  %v1774_v46 = vmul.f32 -1.442695, %v892_v1  ;;  %v889_v54 = vpop.f32.mrf.mxu0  ;;  %1183 = vmatpush.bf16.msrb.mxu1 %v1784_v29 }
 0x500   :  { %2088 = vpow2.f32 %v1773_v42 }
 0x501   :  { %2090 = vpow2.f32 %v1774_v46 }
 0x503   :  { %v863_v12 = vpop.f32.mrf.mxu2  ;;  %v876_v6 = vpop.f32.mrf.mxu3 }
 0x504   :  { %v2769_v6 = vld [vmem:[%s2906_s5] sm:$0x3] }
 0x505   :  { %v2772_v9 = vperm.slane %v2769_v6, 0 }
 0x506   :  { %v2089_v13 = vpop.eup %2088  ;;  %v1156_v1 = vpop.f32.mrf.mxu0 }
 0x507   :  { %v2091_v15 = vpop.eup %2090  ;;  %v899_v17 = vadd.f32 1.0, %v2089_v13  ;;  %v1157_v13 = vadd.f32 %v1156_v1, %v2772_v9 }
 0x508   :  { %v2747_v18 = vadd.f32 1.0, %v2091_v15 }
 0x509   :  { %2092 = vrcp.f32 %v899_v17  ;;  %v912_v52 = vand.u32 2147483648, %v899_v17  ;;  %v910_v59 = vand.u32 2147483647, %v899_v17  ;;  %vm906_vm1 = vweird.f32 %v899_v17 }
 0x50a   :  { %2094 = vrcp.f32 %v2747_v18  ;;  %v927_v37 = vand.u32 2147483648, %v2747_v18  ;;  %vm921_vm5 = vweird.f32 %v2747_v18  ;;  %v925_v48 = vand.u32 2147483647, %v2747_v18 }
 0x50b   :  { %v913_v0 = vor.u32 1.1754944e-38, %v912_v52  ;;  %vm911_vm3 = vcmp.eq.f32.partialorder %v910_v59, 8.507059e+37  ;;  %v940_v52 = vld [vmem:[#allocation3 + $0xa8] sm:$0xff] }
 0x50c   :  { %v928_v46 = vor.u32 1.1754944e-38, %v927_v37  ;;  %vm926_vm7 = vcmp.eq.f32.partialorder %v925_v48, 8.507059e+37 }
 0x50e   :  { %v1158_v4 = vpop.f32.mrf.mxu0 }
 0x50f   :  { %v2093_v31 = vpop.eup %2092 }
 0x510   :  { %v2095_v34 = vpop.eup %2094  ;;  %v902_v38 = vmul.f32 %v2093_v31, %v899_v17  ;;  %vm907_vm0 = vweird.f32 %v2093_v31  ;;  %v1205_v17 = vmax.f32 %v1157_v13, 0.0 }
 0x511   :  { %v917_v41 = vmul.f32 %v2095_v34, %v2747_v18  ;;  %vm908_vm2 = vmor %vm906_vm1, %vm907_vm0  ;;  %vm922_vm4 = vweird.f32 %v2095_v34 }
 0x512   :  { %v903_v47 = vsub.f32 1.0, %v902_v38  ;;  %vm923_vm6 = vmor %vm921_vm5, %vm922_vm4 }
 0x513   :  { %v918_v56 = vsub.f32 1.0, %v917_v41  ;;  %v1991_v41 = vld [vmem:[#allocation11 + $0x70] sm:$0xff] }
 0x514   :  { %v904_v58 = vmul.f32 %v2093_v31, %v903_v47  ;;  %1391 = vmatpush.bf16.msra.mxu3 %v1991_v41  ;;  %v1987_v47 = vld [vmem:[#allocation11 + $0x50] sm:$0xff] }
 0x515   :  { %v919_v10 = vmul.f32 %v2095_v34, %v918_v56 }
 0x516   :  { %v905_v16 = vadd.f32 %v2093_v31, %v904_v58  ;;  %v1161_v11 = vpop.f32.mrf.mxu0  ;;  %v941_v58 = vld [vmem:[#allocation3 + $0xb0] sm:$0xff] }
 0x517   :  { %v920_v32 = vadd.f32 %v2095_v34, %v919_v10  ;;  %v1162_v23 = vadd.f32 %v1161_v11, %v2772_v9 }
 0x518   :  { %v909_v7 = vsel %vm908_vm2, %v2093_v31, %v905_v16  ;;  %1392 = vmatpush.bf16.msra.mxu3 %v1990_v43 }
 0x519   :  { %v914_v22 = vsel %vm911_vm3, %v913_v0, %v909_v7  ;;  %v924_v62 = vsel %vm923_vm6, %v2095_v34, %v920_v32  ;;  %v1209_v26 = vmax.f32 %v1162_v23, 0.0  ;;  %v2000_v23 = vld [vmem:[#allocation12 + $0x38] sm:$0xff] }
 0x51a   :  { %v932_v33 = vmul.f32 %v931_v19, %v914_v22  ;;  %v929_v54 = vsel %vm926_vm7, %v928_v46, %v924_v62  ;;  %1499 = vmatpush.bf16.msra.mxu0 %v2000_v23 }
 0x51b   :  { %v935_v51 = vsub.f32 1.0, %v929_v54  ;;  %v937_v8 = vmul.f32 %v929_v54, %v2726_v35  ;;  %v1159_v35 = vadd.f32 %v1158_v4, %v2772_v9 }
 0x51c   :  { %v933_v42 = vadd.f32 %v932_v33, %v850_v24  ;;  %1393 = vmatpush.bf16.msra.mxu3 %v1989_v36  ;;  %v2784_v24 = vperm.slane %v2769_v6, 1  ;;  %v1997_v36 = vld [vmem:[#allocation12 + $0x20] sm:$0xff] }
 0x51d   :  { %v1207_v15 = vmax.f32 %v1159_v35, 0.0 }
 0x51e   :  { %2096 = vtanh.f32 %v933_v42  ;;  %v1163_v20 = vpop.f32.mrf.mxu0 }
 0x51f   :  { %v1221_v18 = vpack.c.bf16 %v1207_v15, %v1205_v17  ;;  %v1164_v21 = vadd.f32 %v1163_v20, %v2772_v9  ;;  %v942_v15 = vld [vmem:[#allocation3 + $0xb8] sm:$0xff] }
 0x521   :  { %v1211_v25 = vmax.f32 %v1164_v21, 0.0 }
 0x523   :  { %v1223_v30 = vpack.c.bf16 %v1211_v25, %v1209_v26 }
 0x524   :  { %v2097_v55 = vpop.eup %2096 }
 0x525   :  { %v936_v63 = vmul.f32 %v2097_v55, %v935_v51 }
 0x526   :  { %v1166_v61 = vpop.f32.mrf.mxu0 }
 0x527   :  { %v2762_v60 = vadd.f32 %v937_v8, %v936_v63  ;;  %v1167_v34 = vadd.f32 %v1166_v61, %v2772_v9 }
 0x529   :  { %v943_v12 = vpack.c.bf16 %v2762_v60, %v2762_v60  ;;  %v1213_v39 = vmax.f32 %v1167_v34, 0.0 }
 0x52b   :  { %952 = vmatmul.bf16.vlgmr.msra.gmra.mxu1 %v943_v12  ;;  %965 = vmatmul.bf16.vlgmr.msrb.gmra.mxu2 %v943_v12 }
 0x52c   :  { %978 = vmatmul.bf16.vlgmr.msrb.gmra.mxu3 %v943_v12  ;;  %2001 = vmatpush.bf16.msrb.mxu2 %v2000_v23 }
 0x52e   :  { %v1168_v28 = vpop.f32.mrf.mxu0 }
 0x52f   :  { %v1169_v31 = vadd.f32 %v1168_v28, %v2772_v9  ;;  %v1999_v28 = vld [vmem:[#allocation12 + $0x30] sm:$0xff] }
 0x530   :  { %1500 = vmatpush.bf16.msra.mxu0 %v1999_v28  ;;  %2002 = vmatpush.bf16.msrb.mxu2 %v1999_v28 }
 0x531   :  { %v1215_v38 = vmax.f32 %v1169_v31, 0.0 }
 0x53b   :  { %1184 = vmatmul.bf16.vlgmr.msrb.gmra.mxu1 %v2732_v44  ;;  %1369 = vmatmul.bf16.vlgmr.msra.gmra.mxu2 %v1221_v18  ;;  %v1225_v44 = vpack.c.bf16 %v1215_v38, %v1213_v39  ;;  %v1998_v38 = vld [vmem:[#allocation12 + $0x28] sm:$0xff] }
 0x53c   :  { %1501 = vmatpush.bf16.msra.mxu0 %v1998_v38  ;;  %2003 = vmatpush.bf16.msrb.mxu2 %v1998_v38 }
 0x540   :  { %1502 = vmatpush.bf16.msra.mxu0 %v1997_v36  ;;  %2004 = vmatpush.bf16.msrb.mxu2 %v1997_v36 }
 0x54b   :  { %1189 = vmatmul.bf16.gmra.mxu1 %v2737_v14  ;;  %1374 = vmatmul.bf16.gmra.mxu2 %v1223_v30  ;;  %v1988_v14 = vld [vmem:[#allocation11 + $0x58] sm:$0xff] }
 0x54c   :  { %1394 = vmatpush.bf16.msra.mxu3 %v1988_v14 }
 0x550   :  { %1395 = vmatpush.bf16.msra.mxu3 %v1987_v47 }
 0x554   :  { %1396 = vmatpush.bf16.msra.mxu3 %v1986_v49 }
 0x558   :  { %1397 = vmatpush.bf16.msra.mxu3 %v1985_v50 }
 0x55b   :  { %1194 = vmatmul.bf16.gmra.mxu1 %v2742_v53  ;;  %1379 = vmatmul.bf16.gmra.mxu2 %v1225_v44 }
 0x5a8   :  { %v953_v56 = vpop.f32.mrf.mxu1 }
 0x5a9   :  { %v983_v53 = vadd.f32 %v953_v56, %v940_v52 }
 0x5ab   :  { %v1775_v57 = vmul.f32 -1.442695, %v983_v53 }
 0x5ad   :  { %2098 = vpow2.f32 %v1775_v57 }
 0x5ae   :  { %v966_v59 = vpop.f32.mrf.mxu2 }
 0x5af   :  { %v984_v10 = vadd.f32 %v966_v59, %v941_v58  ;;  %v979_v2 = vpop.f32.mrf.mxu3 }
 0x5b0   :  { %v955_v16 = vpop.f32.mrf.mxu1  ;;  %v1023_v6 = vadd.f32 %v2754_v5, %v979_v2 }
 0x5b1   :  { %v1776_v27 = vmul.f32 -1.442695, %v984_v10 }
 0x5b3   :  { %v2099_v45 = vpop.eup %2098  ;;  %2100 = vpow2.f32 %v1776_v27 }
 0x5b4   :  { %v991_v0 = vadd.f32 1.0, %v2099_v45  ;;  %v1996_v45 = vld [vmem:[#allocation12 + $0x18] sm:$0xff] }
 0x5b5   :  { %1503 = vmatpush.bf16.msra.mxu0 %v1996_v45  ;;  %2005 = vmatpush.bf16.msrb.mxu2 %v1996_v45 }
 0x5b6   :  { %2102 = vrcp.f32 %v991_v0  ;;  %v968_v3 = vpop.f32.mrf.mxu2  ;;  %v1004_v1 = vand.u32 2147483648, %v991_v0  ;;  %v1002_v46 = vand.u32 2147483647, %v991_v0  ;;  %vm998_vm9 = vweird.f32 %v991_v0 }
 0x5b7   :  { %v981_v19 = vpop.f32.mrf.mxu3  ;;  %v1993_v3 = vld [vmem:[#allocation12] sm:$0xff] }
 0x5b8   :  { %v1185_v7 = vpop.f32.mrf.mxu1  ;;  %v1005_v12 = vor.u32 1.1754944e-38, %v1004_v1  ;;  %vm1003_vm11 = vcmp.eq.f32.partialorder %v1002_v46, 8.507059e+37 }
 0x5b9   :  { %v2101_v22 = vpop.eup %2100  ;;  %v1186_v48 = vadd.f32 %v1185_v7, %v2784_v24 }
 0x5ba   :  { %v992_v32 = vadd.f32 1.0, %v2101_v22 }
 0x5bb   :  { %v1206_v8 = vmax.f32 %v1186_v48, 0.0 }
 0x5bc   :  { %v2103_v29 = vpop.eup %2102  ;;  %2104 = vrcp.f32 %v992_v32  ;;  %v1019_v21 = vand.u32 2147483648, %v992_v32  ;;  %v1017_v25 = vand.u32 2147483647, %v992_v32  ;;  %vm1013_vm13 = vweird.f32 %v992_v32 }
 0x5bd   :  { %v994_v33 = vmul.f32 %v2103_v29, %v991_v0  ;;  %vm999_vm8 = vweird.f32 %v2103_v29  ;;  %v1995_v0 = vld [vmem:[#allocation12 + $0x10] sm:$0xff] }
 0x5be   :  { %vm1000_vm10 = vmor %vm998_vm9, %vm999_vm8  ;;  %v1020_v31 = vor.u32 1.1754944e-38, %v1019_v21  ;;  %vm1018_vm15 = vcmp.eq.f32.partialorder %v1017_v25, 8.507059e+37  ;;  %1504 = vmatpush.bf16.msra.mxu0 %v1995_v0  ;;  %2006 = vmatpush.bf16.msrb.mxu2 %v1995_v0  ;;  %v1370_v19 = vpop.f32.mrf.mxu2 }
 0x5bf   :  { %v995_v37 = vsub.f32 1.0, %v994_v33 }
 0x5c0   :  { %v1187_v42 = vpop.f32.mrf.mxu1 }
 0x5c1   :  { %v996_v62 = vmul.f32 %v2103_v29, %v995_v37  ;;  %v1188_v54 = vadd.f32 %v1187_v42, %v2784_v24 }
 0x5c2   :  { %v2105_v51 = vpop.eup %2104 }
 0x5c3   :  { %v1009_v55 = vmul.f32 %v2105_v51, %v992_v32  ;;  %v997_v63 = vadd.f32 %v2103_v29, %v996_v62  ;;  %v1208_v4 = vmax.f32 %v1188_v54, 0.0  ;;  %vm1014_vm12 = vweird.f32 %v2105_v51  ;;  %v2798_v32 = vld [vmem:[%s2908_s7] ss:$0 sm:$0xff] }
 0x5c4   :  { %vm1015_vm14 = vmor %vm1013_vm13, %vm1014_vm12 }
 0x5c5   :  { %v1010_v11 = vsub.f32 1.0, %v1009_v55  ;;  %v1001_v35 = vsel %vm1000_vm10, %v2103_v29, %v997_v63  ;;  %v1222_v13 = vpack.c.bf16 %v1208_v4, %v1206_v8  ;;  %v1371_v29 = vadd.f32 %v2798_v32, %v1370_v19 }
 0x5c6   :  { %v1006_v17 = vsel %vm1003_vm11, %v1005_v12, %v1001_v35  ;;  %v1372_v7 = vpop.f32.mrf.mxu2 }
 0x5c7   :  { %v1024_v18 = vmul.f32 %v1023_v6, %v1006_v17  ;;  %1398 = vmatmul.bf16.vlgmr.msra.gmra.mxu3 %v1222_v13  ;;  %v1011_v20 = vmul.f32 %v2105_v51, %v1010_v11  ;;  %v1373_v37 = vadd.f32 %v2798_v32, %v1372_v7 }
 0x5c8   :  { %v1190_v61 = vpop.f32.mrf.mxu1 }
 0x5c9   :  { %v1025_v26 = vadd.f32 %v1024_v18, %v942_v15  ;;  %v1012_v30 = vadd.f32 %v2105_v51, %v1011_v20  ;;  %v1191_v39 = vadd.f32 %v1190_v61, %v2784_v24 }
 0x5cb   :  { %2106 = vtanh.f32 %v1025_v26  ;;  %v1016_v5 = vsel %vm1015_vm14, %v2105_v51, %v1012_v30  ;;  %v1210_v49 = vmax.f32 %v1191_v39, 0.0 }
 0x5cc   :  { %v1021_v34 = vsel %vm1018_vm15, %v1020_v31, %v1016_v5 }
 0x5cd   :  { %v1027_v40 = vsub.f32 1.0, %v1021_v34  ;;  %v1029_v47 = vmul.f32 %v1021_v34, %v2762_v60 }
 0x5ce   :  { %v1375_v33 = vpop.f32.mrf.mxu2 }
 0x5cf   :  { %v1376_v15 = vadd.f32 %v2798_v32, %v1375_v33 }
 0x5d0   :  { %v1192_v44 = vpop.f32.mrf.mxu1 }
 0x5d1   :  { %v2107_v41 = vpop.eup %2106  ;;  %v1193_v43 = vadd.f32 %v1192_v44, %v2784_v24 }
 0x5d2   :  { %v1028_v14 = vmul.f32 %v2107_v41, %v1027_v40 }
 0x5d3   :  { %v1212_v50 = vmax.f32 %v1193_v43, 0.0 }
 0x5d4   :  { %v1030_v52 = vadd.f32 %v1029_v47, %v1028_v14 }
 0x5d5   :  { %v1224_v56 = vpack.c.bf16 %v1212_v50, %v1210_v49  ;;  %v1528_v49 = vlaneseq }
 0x5d6   :  { %v1044_v53 = vpack.c.bf16 %v1030_v52, %v2762_v60  ;;  %1032 = vst [vmem:[#allocation15] sm:$0xff] %v1030_v52  ;;  %v1994_v60 = vld [vmem:[#allocation12 + $0x8] sm:$0xff]  ;;  %v1377_v63 = vpop.f32.mrf.mxu2  ;;  %v2815_v52 = vld [vmem:[%s2910_s9] ss:$0 sm:$0xff]  ;;  %s2359_s9 = smov [#allocation15]  }
 0x5d7   :  { %1403 = vmatmul.bf16.gmra.mxu3 %v1224_v56  ;;  %1505 = vmatpush.bf16.msra.mxu0 %v1994_v60  ;;  %v1378_v23 = vadd.f32 %v2798_v32, %v1377_v63  ;;  %v2810_v50 = vand.u32 127, %v1528_v49  ;;  %s1645_s18 = sshll.u32 %s2359_s9, 4  ;;  %s1646_s18 = int_to_ptr.vmem [resolvable:$true] %s1645_s18 }
 0x5d8   :  { %1170 = vmatmul.bf16.gmra.mxu0 %v1044_v53  ;;  %v1195_v57 = vpop.f32.mrf.mxu1  ;;  %1199 = vmatmul.bf16.gmra.mxu1 %v1044_v53  ;;  %1650 = dma.vmem_to_hbm [thread:$0]  %s1646_s18, 128, %s1648_s21, [#allocation16]  }
 0x5d9   :  { %v1196_v58 = vadd.f32 %v1195_v57, %v2784_v24  ;;  %2007 = vmatpush.bf16.msrb.mxu2 %v1994_v60  ;;  %vm1530_vm0 = vcmp.lt.s32.totalorder %v2810_v50, 4 }
 0x5db   :  { %v1214_v2 = vmax.f32 %v1196_v58, 0.0  ;;  %1506 = vmatpush.bf16.msra.mxu0 %v1993_v3 }
 0x5dd   :  { %2008 = vmatpush.bf16.msrb.mxu2 %v1993_v3 }
 0x5de   :  { %v1380_v5 = vpop.f32.mrf.mxu2 }
 0x5df   :  { %v1381_v39 = vadd.f32 %v2798_v32, %v1380_v5 }
 0x5e0   :  { %v1197_v59 = vpop.f32.mrf.mxu1 }
 0x5e1   :  { %v1198_v10 = vadd.f32 %v1197_v59, %v2784_v24 }
 0x5e3   :  { %v1216_v16 = vmax.f32 %v1198_v10, 0.0 }
 0x5e5   :  { %v1226_v27 = vpack.c.bf16 %v1216_v16, %v1214_v2 }
 0x5e6   :  { %v1382_v38 = vpop.f32.mrf.mxu2 }
 0x5e7   :  { %1408 = vmatmul.bf16.gmra.mxu3 %v1226_v27  ;;  %v1383_v44 = vadd.f32 %v2798_v32, %v1382_v38 }
 0x64a   :  { %v1399_v22 = vpop.f32.mrf.mxu3 }
 0x64b   :  { %v1400_v48 = vadd.f32 %v1399_v22, %v1371_v29 }
 0x64d   :  { %v1419_v62 = vmax.f32 %v1400_v48, 0.0 }
 0x652   :  { %v1401_v1 = vpop.f32.mrf.mxu3 }
 0x653   :  { %v1402_v42 = vadd.f32 %v1401_v1, %v1373_v37 }
 0x655   :  { %v1420_v46 = vmax.f32 %v1402_v42, 0.0  ;;  %v1171_v54 = vpop.f32.mrf.mxu0  ;;  %v1200_v51 = vpop.f32.mrf.mxu1 }
 0x656   :  { %v1172_v4 = vadd.f32 %v1171_v54, %v2772_v9  ;;  %v1201_v12 = vadd.f32 %v1200_v51, %v2784_v24 }
 0x657   :  { %v1427_v55 = vpack.c.bf16 %v1420_v46, %v1419_v62 }
 0x658   :  { %v1217_v17 = vmax.f32 %v1172_v4, 0.0  ;;  %v1218_v18 = vmax.f32 %v1201_v12, 0.0 }
 0x659   :  { %1507 = vmatmul.bf16.vlgmr.msra.gmra.mxu0 %v1427_v55 }
 0x65a   :  { %v1404_v8 = vpop.f32.mrf.mxu3 }
 0x65b   :  { %v1405_v61 = vadd.f32 %v1404_v8, %v1376_v15 }
 0x65d   :  { %v1173_v6 = vpop.f32.mrf.mxu0  ;;  %v1202_v11 = vpop.f32.mrf.mxu1  ;;  %v1421_v31 = vmax.f32 %v1405_v61, 0.0 }
 0x65e   :  { %v1174_v35 = vadd.f32 %v1173_v6, %v2772_v9  ;;  %v1203_v13 = vadd.f32 %v1202_v11, %v2784_v24 }
 0x660   :  { %v1219_v20 = vmax.f32 %v1174_v35, 0.0  ;;  %v1220_v21 = vmax.f32 %v1203_v13, 0.0 }
 0x662   :  { %v1406_v25 = vpop.f32.mrf.mxu3  ;;  %v1227_v26 = vpack.c.bf16 %v1219_v20, %v1217_v17  ;;  %v1228_v30 = vpack.c.bf16 %v1220_v21, %v1218_v18 }
 0x663   :  { %v1407_v28 = vadd.f32 %v1406_v25, %v1378_v23 }
 0x664   :  { %1384 = vmatmul.bf16.gmra.mxu2 %v1227_v26  ;;  %1413 = vmatmul.bf16.gmra.mxu3 %v1228_v30 }
 0x665   :  { %v1422_v9 = vmax.f32 %v1407_v28, 0.0 }
 0x667   :  { %v1428_v34 = vpack.c.bf16 %v1422_v9, %v1421_v31 }
 0x669   :  { %1512 = vmatmul.bf16.gmra.mxu0 %v1428_v34 }
 0x66a   :  { %v1409_v24 = vpop.f32.mrf.mxu3 }
 0x66b   :  { %v1410_v40 = vadd.f32 %v1409_v24, %v1381_v39 }
 0x66d   :  { %v1423_v36 = vmax.f32 %v1410_v40, 0.0 }
 0x672   :  { %v1411_v41 = vpop.f32.mrf.mxu3 }
 0x673   :  { %v1412_v43 = vadd.f32 %v1411_v41, %v1383_v44 }
 0x675   :  { %v1424_v14 = vmax.f32 %v1412_v43, 0.0 }
 0x677   :  { %v1429_v47 = vpack.c.bf16 %v1424_v14, %v1423_v36 }
 0x679   :  { %1517 = vmatmul.bf16.gmra.mxu0 %v1429_v47 }
 0x6d6   :  { %v1508_v56 = vpop.f32.mrf.mxu0 }
 0x6d7   :  { %v2819_v53 = vadd.f32 %v2815_v52, %v1508_v56 }
 0x6d9   :  { %v1531_v57 = vsel %vm1530_vm0, %v2819_v53, -1e+30 }
 0x6da   :  { %1539 = vmax.xlane.f32.xlu0 %v1531_v57 }
 0x6de   :  { %v1510_v58 = vpop.f32.mrf.mxu0 }
 0x6df   :  { %v2825_v59 = vadd.f32 %v2815_v52, %v1510_v58 }
 0x6e1   :  { %v1532_v10 = vsel %vm1530_vm0, %v2825_v59, -1e+30 }
 0x6e2   :  { %1541 = vmax.xlane.f32.xlu0 %v1532_v10 }
 0x6e6   :  { %v1513_v2 = vpop.f32.mrf.mxu0 }
 0x6e7   :  { %v2831_v16 = vadd.f32 %v2815_v52, %v1513_v2  ;;  %v1385_v27 = vpop.f32.mrf.mxu2  ;;  %v1414_v45 = vpop.f32.mrf.mxu3 }
 0x6e8   :  { %v1386_v60 = vadd.f32 %v2798_v32, %v1385_v27 }
 0x6e9   :  { %v1533_v0 = vsel %vm1530_vm0, %v2831_v16, -1e+30 }
 0x6ea   :  { %1543 = vmax.xlane.f32.xlu1 %v1533_v0  ;;  %v1415_v22 = vadd.f32 %v1414_v45, %v1386_v60 }
 0x6ec   :  { %v1425_v1 = vmax.f32 %v1415_v22, 0.0 }
 0x6ee   :  { %v1515_v3 = vpop.f32.mrf.mxu0 }
 0x6ef   :  { %v2838_v19 = vadd.f32 %v2815_v52, %v1515_v3  ;;  %v1387_v7 = vpop.f32.mrf.mxu2  ;;  %v1416_v33 = vpop.f32.mrf.mxu3 }
 0x6f0   :  { %v1388_v29 = vadd.f32 %v2798_v32, %v1387_v7 }
 0x6f1   :  { %v1534_v37 = vsel %vm1530_vm0, %v2838_v19, -1e+30 }
 0x6f2   :  { %v1417_v48 = vadd.f32 %v1416_v33, %v1388_v29  ;;  %1545 = vmax.xlane.f32.xlu1 %v1534_v37 }
 0x6f4   :  { %v1426_v42 = vmax.f32 %v1417_v48, 0.0 }
 0x6f6   :  { %v1430_v62 = vpack.c.bf16 %v1426_v42, %v1425_v1  ;;  %v1518_v46 = vpop.f32.mrf.mxu0 }
 0x6f7   :  { %v2845_v54 = vadd.f32 %v2815_v52, %v1518_v46 }
 0x6f8   :  { %1522 = vmatmul.bf16.vlgmr.msrb.gmra.mxu2 %v1430_v62 }
 0x6f9   :  { %v1535_v51 = vsel %vm1530_vm0, %v2845_v54, -1e+30 }
 0x6fa   :  { %1547 = vmax.xlane.f32.xlu2 %v1535_v51 }
 0x6fe   :  { %v1520_v32 = vpop.f32.mrf.mxu0 }
 0x6ff   :  { %v2851_v55 = vadd.f32 %v2815_v52, %v1520_v32 }
 0x701   :  { %v1536_v63 = vsel %vm1530_vm0, %v2851_v55, -1e+30 }
 0x702   :  { %1549 = vmax.xlane.f32.xlu2 %v1536_v63 }
 0x74d   :  { %v1540_v8 = vpop.xlane.xlu0 %1539 }
 0x74e   :  { %v1555_v4 = vsub.f32 %v1531_v57, %v1540_v8 }
 0x750   :  { %v1563_v12 = vmul.f32 1.442695, %v1555_v4 }
 0x752   :  { %2108 = vpow2.f32 %v1563_v12 }
 0x755   :  { %v1542_v18 = vpop.xlane.xlu0 %1541 }
 0x756   :  { %v1556_v20 = vsub.f32 %v1532_v10, %v1542_v18 }
 0x758   :  { %v2109_v6 = vpop.eup %2108  ;;  %v1565_v61 = vmul.f32 1.442695, %v1556_v20 }
 0x759   :  { %1579 = vadd.xlane.f32.xlu2 %v2109_v6 }
 0x75d   :  { %v1544_v11 = vpop.xlane.xlu1 %1543 }
 0x75e   :  { %v1557_v30 = vsub.f32 %v1533_v0, %v1544_v11 }
 0x760   :  { %v1567_v5 = vmul.f32 1.442695, %v1557_v30 }
 0x765   :  { %v1546_v35 = vpop.xlane.xlu1 %1545 }
 0x766   :  { %v1558_v13 = vsub.f32 %v1534_v37, %v1546_v35 }
 0x768   :  { %v1569_v15 = vmul.f32 1.442695, %v1558_v13 }
 0x76a   :  { %2110 = vpow2.f32 %v1569_v15 }
 0x76b   :  { %2112 = vpow2.f32 %v1565_v61 }
 0x76c   :  { %2114 = vpow2.f32 %v1567_v5 }
 0x76d   :  { %v1548_v21 = vpop.xlane.xlu2 %1547 }
 0x76e   :  { %v1559_v28 = vsub.f32 %v1535_v51, %v1548_v21 }
 0x770   :  { %v2111_v17 = vpop.eup %2110  ;;  %v1571_v9 = vmul.f32 1.442695, %v1559_v28 }
 0x771   :  { %1585 = vadd.xlane.f32.xlu2 %v2111_v17  ;;  %v2113_v38 = vpop.eup %2112 }
 0x772   :  { %2116 = vpow2.f32 %v1571_v9  ;;  %v2115_v41 = vpop.eup %2114 }
 0x775   :  { %v1550_v24 = vpop.xlane.xlu2 %1549 }
 0x776   :  { %v1560_v44 = vsub.f32 %v1536_v63, %v1550_v24 }
 0x778   :  { %v1573_v40 = vmul.f32 1.442695, %v1560_v44  ;;  %v2117_v43 = vpop.eup %2116 }
 0x77a   :  { %2118 = vpow2.f32 %v1573_v40 }
 0x77b   :  { %v1523_v23 = vpop.f32.mrf.mxu2 }
 0x77c   :  { %v2857_v25 = vadd.f32 %v2815_v52, %v1523_v23 }
 0x77e   :  { %v1537_v26 = vsel %vm1530_vm0, %v2857_v25, -1e+30 }
 0x77f   :  { %1551 = vmax.xlane.f32.xlu0 %v1537_v26 }
 0x780   :  { %v2119_v36 = vpop.eup %2118 }
 0x783   :  { %v1525_v31 = vpop.f32.mrf.mxu2 }
 0x784   :  { %v2863_v34 = vadd.f32 %v2815_v52, %v1525_v31 }
 0x786   :  { %v1538_v39 = vsel %vm1530_vm0, %v2863_v34, -1e+30 }
 0x787   :  { %1553 = vmax.xlane.f32.xlu1 %v1538_v39  ;;  %1581 = vadd.xlane.f32.xlu0 %v2113_v38 }
 0x78f   :  { %1583 = vadd.xlane.f32.xlu1 %v2115_v41  ;;  %1587 = vadd.xlane.f32.xlu0 %v2117_v43 }
 0x797   :  { %1589 = vadd.xlane.f32.xlu1 %v2119_v36 }
 0x7cc   :  { %v1580_v14 = vpop.xlane.xlu2 %1579 }
 0x7cd   :  { %2120 = vrcp.f32 %v1580_v14 }
 0x7d3   :  { %v2121_v47 = vpop.eup %2120 }
 0x7d4   :  { %v1603_v49 = vmul.f32 %v2121_v47, %v2109_v6 }
 0x7d6   :  { %v1611_v52 = vsel %vm1530_vm0, %v1603_v49, %v2819_v53 }
 0x7d7   :  { %1619 = vst [vmem:[#allocation14] sm:$0xff] %v1611_v52 }
 0x7e4   :  { %v1586_v56 = vpop.xlane.xlu2 %1585 }
 0x7e5   :  { %2122 = vrcp.f32 %v1586_v56 }
 0x7eb   :  { %v2123_v57 = vpop.eup %2122 }
 0x7ec   :  { %v1606_v58 = vmul.f32 %v2123_v57, %v2111_v17 }
 0x7ee   :  { %v1614_v10 = vsel %vm1530_vm0, %v1606_v58, %v2838_v19 }
 0x7ef   :  { %1622 = vst [vmem:[#allocation14 + $0x18] sm:$0xff] %v1614_v10 }
 0x7f2   :  { %v1552_v2 = vpop.xlane.xlu0 %1551 }
 0x7f3   :  { %v1561_v27 = vsub.f32 %v1537_v26, %v1552_v2 }
 0x7f5   :  { %v1575_v45 = vmul.f32 1.442695, %v1561_v27 }
 0x7f7   :  { %2124 = vpow2.f32 %v1575_v45 }
 0x7fa   :  { %v1554_v0 = vpop.xlane.xlu1 %1553  ;;  %v1582_v60 = vpop.xlane.xlu0 %1581 }
 0x7fb   :  { %v1562_v3 = vsub.f32 %v1538_v39, %v1554_v0  ;;  %2126 = vrcp.f32 %v1582_v60 }
 0x7fd   :  { %v2125_v7 = vpop.eup %2124  ;;  %v1577_v53 = vmul.f32 1.442695, %v1562_v3 }
 0x7fe   :  { %1591 = vadd.xlane.f32.xlu2 %v2125_v7 }
 0x7ff   :  { %2128 = vpow2.f32 %v1577_v53 }
 0x801   :  { %v2127_v22 = vpop.eup %2126 }
 0x802   :  { %v1604_v29 = vmul.f32 %v2127_v22, %v2113_v38  ;;  %v1584_v33 = vpop.xlane.xlu1 %1583  ;;  %v1588_v37 = vpop.xlane.xlu0 %1587 }
 0x803   :  { %2130 = vrcp.f32 %v1584_v33 }
 0x804   :  { %v1612_v19 = vsel %vm1530_vm0, %v1604_v29, %v2825_v59  ;;  %2132 = vrcp.f32 %v1588_v37 }
 0x805   :  { %v2129_v48 = vpop.eup %2128  ;;  %1620 = vst [vmem:[#allocation14 + $0x8] sm:$0xff] %v1612_v19 }
 0x806   :  { %1593 = vadd.xlane.f32.xlu0 %v2129_v48 }
 0x809   :  { %v2131_v1 = vpop.eup %2130 }
 0x80a   :  { %v2133_v42 = vpop.eup %2132  ;;  %v1605_v62 = vmul.f32 %v2131_v1, %v2115_v41  ;;  %v1590_v46 = vpop.xlane.xlu1 %1589 }
 0x80b   :  { %v1607_v51 = vmul.f32 %v2133_v42, %v2117_v43  ;;  %2134 = vrcp.f32 %v1590_v46 }
 0x80c   :  { %v1613_v59 = vsel %vm1530_vm0, %v1605_v62, %v2831_v16 }
 0x80d   :  { %1621 = vst [vmem:[#allocation14 + $0x10] sm:$0xff] %v1613_v59  ;;  %v1615_v32 = vsel %vm1530_vm0, %v1607_v51, %v2845_v54 }
 0x80e   :  { %1623 = vst [vmem:[#allocation14 + $0x20] sm:$0xff] %v1615_v32 }
 0x811   :  { %v2135_v63 = vpop.eup %2134 }
 0x812   :  { %v1608_v8 = vmul.f32 %v2135_v63, %v2119_v36 }
 0x814   :  { %v1616_v4 = vsel %vm1530_vm0, %v1608_v8, %v2851_v55 }
 0x815   :  { %1624 = vst [vmem:[#allocation14 + $0x28] sm:$0xff] %v1616_v4 }
 0x871   :  { %v1592_v12 = vpop.xlane.xlu2 %1591 }
 0x872   :  { %2136 = vrcp.f32 %v1592_v12 }
 0x878   :  { %v2137_v6 = vpop.eup %2136 }
 0x879   :  { %v1609_v11 = vmul.f32 %v2137_v6, %v2125_v7  ;;  %v1594_v35 = vpop.xlane.xlu0 %1593 }
 0x87a   :  { %2138 = vrcp.f32 %v1594_v35 }
 0x87b   :  { %v1617_v16 = vsel %vm1530_vm0, %v1609_v11, %v2857_v25 }
 0x87c   :  { %1625 = vst [vmem:[#allocation14 + $0x30] sm:$0xff] %v1617_v16 }
 0x880   :  { %v2139_v54 = vpop.eup %2138 }
 0x881   :  { %v1610_v55 = vmul.f32 %v2139_v54, %v2129_v48 }
 0x883   :  { %v1618_v13 = vsel %vm1530_vm0, %v1610_v55, %v2863_v34 }
 0x884   :  { %1626 = vst [vmem:[#allocation14 + $0x38] sm:$0xff] %v1618_v13 }
 0x885   :  { %1639 = dma.vmem_to_hbm [thread:$0]  %s1632_s22, 1024, %s1634_s24, [#allocation5], %s2347_s27, %s2347_s27, %s2348_s28  }
 0x886   :  { %2341 = dma.done.wait [#allocation5], 1024  }
 0x887   :  { %2342 = vsyncadd [#allocation5], 4294966272 }
 0x888   :  { %2343 = dma.done.wait [#allocation16], 128  }
 0x889   :  { %2344 = vsyncadd [#allocation16], 4294967168 }
 0x88a   :  { %1659 = vsyncpa [#allocation4], 1 }
 0x88b   :  { %1660 = vsyncpa [#allocation7], 1 }
 0x88c   :  { %1661 = vsyncpa [#allocation10], 1 }
 0x88d   :  { %1662 = vsyncpa [#allocation13], 1 }
 0x88e   :  { %1663 = vsyncpa [#allocation5], 1 }
 0x88f   :  { %1664 = vsyncpa [#allocation16], 1 }

</bundles_post_ra>
